<compile_context>
chip_gen: v7x
topology: tpu7x:2x2x1
jax: 0.10.0
libtpu: 0.0.40
codegen_flags: <defaults>
</compile_context>

<pallas_src>
import functools
import math

import jax
import jax.numpy as jnp
from jax.experimental import pallas as pl
from jax.experimental.pallas import tpu as pltpu


# ----------------------------- fused Pallas kernel ----------------------------- #

def _layernorm(x, g, b, eps=1e-12):
    mean = jnp.mean(x, axis=-1, keepdims=True)
    var = jnp.mean((x - mean) ** 2, axis=-1, keepdims=True)
    inv = jax.lax.rsqrt(var + eps)
    return (x - mean) * inv * g + b


def _gelu(x):
    # tanh-approx GELU
    return 0.5 * x * (1.0 + jnp.tanh(0.7978845608028654 * (x + 0.044715 * x * x * x)))


def _make_fused_bert_kernel(B, S, H, nH, Dh, FF, L):
    scale = 1.0 / math.sqrt(Dh)

    def kernel(x_ref, embg_ref, embb_ref, mask_ref,
               wqkv_ref, bqkv_ref, wo_ref, bo_ref,
               ln1g_ref, ln1b_ref, wff1_ref, bff1_ref,
               wff2_ref, bff2_ref, ln2g_ref, ln2b_ref,
               poolw_ref, poolb_ref, clsw_ref, clsb_ref, label_ref,
               loss_ref):
        # ---- embedding LayerNorm ----
        x = _layernorm(x_ref[...], embg_ref[...], embb_ref[...])        # [B*S, H]
        mask_bias = mask_ref[...]                                       # [B, S]

        # ---- transformer layers (static unroll, weights stay resident in VMEM) ----
        for l in range(L):
            # fused QKV projection: single MXU push with 3H output lanes
            qkv = jnp.dot(x, wqkv_ref[l], preferred_element_type=jnp.float32) + bqkv_ref[l]
            q = qkv[:, 0 * H:1 * H]
            k = qkv[:, 1 * H:2 * H]
            v = qkv[:, 2 * H:3 * H]

            # attention: static unroll over (batch, head); each head is a lane slice of H
            ctx_rows = []
            for b in range(B):
                bias = mask_bias[b:b + 1, :]                            # [1, S]
                heads = []
                for h in range(nH):
                    qb = q[b * S:(b + 1) * S, h * Dh:(h + 1) * Dh]      # [S, Dh]
                    kb = k[b * S:(b + 1) * S, h * Dh:(h + 1) * Dh]
                    vb = v[b * S:(b + 1) * S, h * Dh:(h + 1) * Dh]
                    s = jnp.einsum("qd,kd->qk", qb, kb,
                                   preferred_element_type=jnp.float32) * scale
                    s = s + bias                                        # broadcast over rows
                    m = jnp.max(s, axis=-1, keepdims=True)
                    p = jnp.exp(s - m)
                    denom = jnp.sum(p, axis=-1, keepdims=True)
                    p = p * pl.reciprocal(denom, approx=True)           # EUP reciprocal
                    heads.append(jnp.einsum("qk,kd->qd", p, vb,
                                            preferred_element_type=jnp.float32))
                ctx_rows.append(jnp.concatenate(heads, axis=1))         # [S, H]
            ctx = jnp.concatenate(ctx_rows, axis=0)                     # [B*S, H]

            # output projection + residual fused into LayerNorm
            attn_out = jnp.dot(ctx, wo_ref[l], preferred_element_type=jnp.float32) + bo_ref[l]
            x = _layernorm(x + attn_out, ln1g_ref[l], ln1b_ref[l])

            # feed-forward + residual fused into LayerNorm
            ff = _gelu(jnp.dot(x, wff1_ref[l],
                               preferred_element_type=jnp.float32) + bff1_ref[l])
            ff = jnp.dot(ff, wff2_ref[l], preferred_element_type=jnp.float32) + bff2_ref[l]
            x = _layernorm(x + ff, ln2g_ref[l], ln2b_ref[l])

        # ---- pooler: tanh(W * h_[CLS] + b), CLS rows sliced in-kernel ----
        cls_tok = jnp.concatenate([x[b * S:b * S + 1, :] for b in range(B)], axis=0)  # [B, H]
        pooled = jnp.tanh(jnp.dot(cls_tok, poolw_ref[...],
                                  preferred_element_type=jnp.float32) + poolb_ref[...])

        # dropout == identity (eval mode)

        # ---- classifier on the VPU (1-column matmul is not worth an MXU push) ----
        scores = jnp.sum(pooled * clsw_ref[...], axis=-1, keepdims=True) + clsb_ref[...]  # [B, 1]

        # ---- sigmoid + BCE (mean reduction), numerically stable log-sigmoid form ----
        # log(sigmoid(s)) = -softplus(-s), log(1 - sigmoid(s)) = -softplus(s)
        y = label_ref[...]                                              # [B, 1]
        stab = jnp.log(1.0 + jnp.exp(-jnp.abs(scores)))
        softplus_pos = jnp.maximum(scores, 0.0) + stab                  # softplus(s)
        softplus_neg = jnp.maximum(-scores, 0.0) + stab                 # softplus(-s)
        log_p = jnp.maximum(-softplus_neg, -100.0)                      # BCELoss clamp
        log_1mp = jnp.maximum(-softplus_pos, -100.0)
        per_example = -(y * log_p + (1.0 - y) * log_1mp)                # [B, 1]
        loss_ref[...] = jnp.mean(per_example).reshape(1, 1)

    return kernel


def _full_spec(shape):
    zeros = (0,) * len(shape)
    return pl.BlockSpec(shape, lambda i: zeros)


# ----------------------------- Mini-BERT model ----------------------------- #

CFG = dict(
    vocab_size=50,
    type_vocab_size=2,
    max_position=16,
    hidden=32,
    heads=2,
    head_dim=16,
    intermediate=64,
    layers=2,
)


def init_params(key, cfg):
    std = 0.02
    ks = iter(jax.random.split(key, 64))
    p = {}
    p["word_emb"] = std * jax.random.normal(next(ks), (cfg["vocab_size"], cfg["hidden"]))
    p["pos_emb"] = std * jax.random.normal(next(ks), (cfg["max_position"], cfg["hidden"]))
    p["type_emb"] = std * jax.random.normal(next(ks), (cfg["type_vocab_size"], cfg["hidden"]))
    p["emb_ln_g"] = jnp.ones((cfg["hidden"],))
    p["emb_ln_b"] = jnp.zeros((cfg["hidden"],))
    p["layers"] = []
    H, FF = cfg["hidden"], cfg["intermediate"]
    for _ in range(cfg["layers"]):
        lyr = {
            "wq": std * jax.random.normal(next(ks), (H, H)), "bq": jnp.zeros((H,)),
            "wk": std * jax.random.normal(next(ks), (H, H)), "bk": jnp.zeros((H,)),
            "wv": std * jax.random.normal(next(ks), (H, H)), "bv": jnp.zeros((H,)),
            "wo": std * jax.random.normal(next(ks), (H, H)), "bo": jnp.zeros((H,)),
            "ln1_g": jnp.ones((H,)), "ln1_b": jnp.zeros((H,)),
            "w_ff1": std * jax.random.normal(next(ks), (H, FF)), "b_ff1": jnp.zeros((FF,)),
            "w_ff2": std * jax.random.normal(next(ks), (FF, H)), "b_ff2": jnp.zeros((H,)),
            "ln2_g": jnp.ones((H,)), "ln2_b": jnp.zeros((H,)),
        }
        p["layers"].append(lyr)
    p["pool_w"] = std * jax.random.normal(next(ks), (H, H))
    p["pool_b"] = jnp.zeros((H,))
    # classifier init matches init_weights(initrange=0.1); stored as a [1, H] row vector
    # so the in-kernel classifier is a VPU multiply-reduce rather than an MXU matmul.
    p["cls_w"] = jax.random.uniform(next(ks), (1, H), minval=-0.1, maxval=0.1)
    p["cls_b"] = jax.random.uniform(next(ks), (1,), minval=-0.1, maxval=0.1)
    return jax.tree_util.tree_map(lambda a: a.astype(jnp.float32), p)


def bert_binary_classification_forward(params, word_ids, segment_ids, masks, label, cfg):
    B, S = word_ids.shape
    H, nH, Dh = cfg["hidden"], cfg["heads"], cfg["head_dim"]
    FF, L = cfg["intermediate"], cfg["layers"]

    # ---- embeddings (token gathers are glue; everything else is in the fused kernel) ----
    pos_ids = jnp.arange(S)
    x = (params["word_emb"][word_ids]
         + params["pos_emb"][pos_ids][None, :, :]
         + params["type_emb"][segment_ids]).reshape(B * S, H).astype(jnp.float32)

    # attention mask bias kept as [B, S]; broadcast per batch inside the kernel
    mask_bias = (1.0 - masks.astype(jnp.float32)) * -10000.0

    # ---- stack per-layer weights along a leading L axis; fuse QKV to [L, H, 3H] ----
    layers = params["layers"]
    stack2 = lambda key: jnp.stack([lyr[key] for lyr in layers], axis=0)           # [L, A, B]
    stack1 = lambda key: jnp.stack([lyr[key] for lyr in layers], axis=0)[:, None]  # [L, 1, A]

    wqkv = jnp.stack([jnp.concatenate([lyr["wq"], lyr["wk"], lyr["wv"]], axis=1)
                      for lyr in layers], axis=0)                                  # [L, H, 3H]
    bqkv = jnp.stack([jnp.concatenate([lyr["bq"], lyr["bk"], lyr["bv"]])[None, :]
                      for lyr in layers], axis=0)                                  # [L, 1, 3H]

    args = [
        x, params["emb_ln_g"].reshape(1, H), params["emb_ln_b"].reshape(1, H), mask_bias,
        wqkv, bqkv, stack2("wo"), stack1("bo"),
        stack1("ln1_g"), stack1("ln1_b"), stack2("w_ff1"), stack1("b_ff1"),
        stack2("w_ff2"), stack1("b_ff2"), stack1("ln2_g"), stack1("ln2_b"),
        params["pool_w"], params["pool_b"].reshape(1, H),
        params["cls_w"], params["cls_b"].reshape(1, 1),
        label.reshape(B, 1).astype(jnp.float32),
    ]

    loss = pl.pallas_call(
        _make_fused_bert_kernel(B, S, H, nH, Dh, FF, L),
        out_shape=jax.ShapeDtypeStruct((1, 1), jnp.float32),
        grid=(1,),
        in_specs=[_full_spec(a.shape) for a in args],
        out_specs=_full_spec((1, 1)),
        compiler_params=pltpu.CompilerParams(dimension_semantics=("arbitrary",)),
    )(*args)
    return loss[0, 0]


# --------------------------------- main ------------------------------------ #

if __name__ == "__main__":
    B, S = 2, 8
    key = jax.random.PRNGKey(0)
    k_param, k_ids, k_lab = jax.random.split(key, 3)

    params = init_params(k_param, CFG)

    word_ids = jax.random.randint(k_ids, (B, S), 0, CFG["vocab_size"], dtype=jnp.int32)
    segment_ids = jnp.zeros((B, S), dtype=jnp.int32).at[:, S // 2:].set(1)
    masks = jnp.ones((B, S), dtype=jnp.int32).at[0, -2:].set(0)     # pad tail of example 0
    label = jax.random.bernoulli(k_lab, 0.5, (B,)).astype(jnp.float32)

    loss = bert_binary_classification_forward(params, word_ids, segment_ids, masks, label, CFG)
    loss = jax.block_until_ready(loss)
    assert jnp.isfinite(loss)
    print("KERNEL_OK")
</pallas_src>

<mosaic_0001>
module attributes {stable_mosaic.version = 11 : i64} {
  func.func @kernel(%arg0: i32, %arg1: memref<16x32xf32, #tpu.memory_space<vmem>>, %arg2: memref<1x32xf32, #tpu.memory_space<vmem>>, %arg3: memref<1x32xf32, #tpu.memory_space<vmem>>, %arg4: memref<2x8xf32, #tpu.memory_space<vmem>>, %arg5: memref<2x32x96xf32, #tpu.memory_space<vmem>>, %arg6: memref<2x1x96xf32, #tpu.memory_space<vmem>>, %arg7: memref<2x32x32xf32, #tpu.memory_space<vmem>>, %arg8: memref<2x1x32xf32, #tpu.memory_space<vmem>>, %arg9: memref<2x1x32xf32, #tpu.memory_space<vmem>>, %arg10: memref<2x1x32xf32, #tpu.memory_space<vmem>>, %arg11: memref<2x32x64xf32, #tpu.memory_space<vmem>>, %arg12: memref<2x1x64xf32, #tpu.memory_space<vmem>>, %arg13: memref<2x64x32xf32, #tpu.memory_space<vmem>>, %arg14: memref<2x1x32xf32, #tpu.memory_space<vmem>>, %arg15: memref<2x1x32xf32, #tpu.memory_space<vmem>>, %arg16: memref<2x1x32xf32, #tpu.memory_space<vmem>>, %arg17: memref<32x32xf32, #tpu.memory_space<vmem>>, %arg18: memref<1x32xf32, #tpu.memory_space<vmem>>, %arg19: memref<1x32xf32, #tpu.memory_space<vmem>>, %arg20: memref<1x1xf32, #tpu.memory_space<vmem>>, %arg21: memref<2x1xf32, #tpu.memory_space<vmem>>, %arg22: memref<1x1xf32, #tpu.memory_space<vmem>>) attributes {dimension_semantics = [#tpu.dimension_semantics<arbitrary>], iteration_bounds = array<i64: 1>, scalar_prefetch = 0 : i64, scratch_operands = 0 : i64, tpu.core_type = #tpu.core_type<tc>, window_params = [{pipeline_mode = #tpu.pipeline_mode<synchronous>, transform_indices = @transform_0, window_bounds = array<i64: 16, 32>}, {pipeline_mode = #tpu.pipeline_mode<synchronous>, transform_indices = @transform_1, window_bounds = array<i64: 1, 32>}, {pipeline_mode = #tpu.pipeline_mode<synchronous>, transform_indices = @transform_2, window_bounds = array<i64: 1, 32>}, {pipeline_mode = #tpu.pipeline_mode<synchronous>, transform_indices = @transform_3, window_bounds = array<i64: 2, 8>}, {pipeline_mode = #tpu.pipeline_mode<synchronous>, transform_indices = @transform_4, window_bounds = array<i64: 2, 32, 96>}, {pipeline_mode = #tpu.pipeline_mode<synchronous>, transform_indices = @transform_5, window_bounds = array<i64: 2, 1, 96>}, {pipeline_mode = #tpu.pipeline_mode<synchronous>, transform_indices = @transform_6, window_bounds = array<i64: 2, 32, 32>}, {pipeline_mode = #tpu.pipeline_mode<synchronous>, transform_indices = @transform_7, window_bounds = array<i64: 2, 1, 32>}, {pipeline_mode = #tpu.pipeline_mode<synchronous>, transform_indices = @transform_8, window_bounds = array<i64: 2, 1, 32>}, {pipeline_mode = #tpu.pipeline_mode<synchronous>, transform_indices = @transform_9, window_bounds = array<i64: 2, 1, 32>}, {pipeline_mode = #tpu.pipeline_mode<synchronous>, transform_indices = @transform_10, window_bounds = array<i64: 2, 32, 64>}, {pipeline_mode = #tpu.pipeline_mode<synchronous>, transform_indices = @transform_11, window_bounds = array<i64: 2, 1, 64>}, {pipeline_mode = #tpu.pipeline_mode<synchronous>, transform_indices = @transform_12, window_bounds = array<i64: 2, 64, 32>}, {pipeline_mode = #tpu.pipeline_mode<synchronous>, transform_indices = @transform_13, window_bounds = array<i64: 2, 1, 32>}, {pipeline_mode = #tpu.pipeline_mode<synchronous>, transform_indices = @transform_14, window_bounds = array<i64: 2, 1, 32>}, {pipeline_mode = #tpu.pipeline_mode<synchronous>, transform_indices = @transform_15, window_bounds = array<i64: 2, 1, 32>}, {pipeline_mode = #tpu.pipeline_mode<synchronous>, transform_indices = @transform_16, window_bounds = array<i64: 32, 32>}, {pipeline_mode = #tpu.pipeline_mode<synchronous>, transform_indices = @transform_17, window_bounds = array<i64: 1, 32>}, {pipeline_mode = #tpu.pipeline_mode<synchronous>, transform_indices = @transform_18, window_bounds = array<i64: 1, 32>}, {pipeline_mode = #tpu.pipeline_mode<synchronous>, transform_indices = @transform_19, window_bounds = array<i64: 1, 1>}, {pipeline_mode = #tpu.pipeline_mode<synchronous>, transform_indices = @transform_20, window_bounds = array<i64: 2, 1>}, {pipeline_mode = #tpu.pipeline_mode<synchronous>, transform_indices = @transform_21, window_bounds = array<i64: 1, 1>}]} {
    %c0 = arith.constant 0 : index
    %c0_0 = arith.constant 0 : index
    %0 = vector.load %arg1[%c0, %c0_0] : memref<16x32xf32, #tpu.memory_space<vmem>>, vector<16x32xf32>
    %c0_1 = arith.constant 0 : index
    %c0_2 = arith.constant 0 : index
    %1 = vector.load %arg2[%c0_1, %c0_2] : memref<1x32xf32, #tpu.memory_space<vmem>>, vector<1x32xf32>
    %c0_3 = arith.constant 0 : index
    %c0_4 = arith.constant 0 : index
    %2 = vector.load %arg3[%c0_3, %c0_4] : memref<1x32xf32, #tpu.memory_space<vmem>>, vector<1x32xf32>
    %cst = arith.constant dense<0.000000e+00> : vector<16xf32>
    %3 = vector.multi_reduction <add>, %0, %cst [1] : vector<16x32xf32> to vector<16xf32>
    %4 = vector.shape_cast %3 : vector<16xf32> to vector<16x1xf32>
    %cst_5 = arith.constant 3.200000e+01 : f32
    %5 = vector.broadcast %cst_5 : f32 to vector<16x1xf32>
    %6 = arith.divf %4, %5 : vector<16x1xf32>
    %7 = vector.broadcast %6 : vector<16x1xf32> to vector<16x32xf32>
    %8 = arith.subf %0, %7 : vector<16x32xf32>
    %9 = arith.mulf %8, %8 : vector<16x32xf32>
    %cst_6 = arith.constant dense<0.000000e+00> : vector<16xf32>
    %10 = vector.multi_reduction <add>, %9, %cst_6 [1] : vector<16x32xf32> to vector<16xf32>
    %11 = vector.shape_cast %10 : vector<16xf32> to vector<16x1xf32>
    %cst_7 = arith.constant 3.200000e+01 : f32
    %12 = vector.broadcast %cst_7 : f32 to vector<16x1xf32>
    %13 = arith.divf %11, %12 : vector<16x1xf32>
    %cst_8 = arith.constant 9.99999996E-13 : f32
    %14 = vector.broadcast %cst_8 : f32 to vector<16x1xf32>
    %15 = arith.addf %13, %14 : vector<16x1xf32>
    %16 = math.rsqrt %15 : vector<16x1xf32>
    %17 = vector.broadcast %6 : vector<16x1xf32> to vector<16x32xf32>
    %18 = arith.subf %0, %17 : vector<16x32xf32>
    %19 = vector.broadcast %16 : vector<16x1xf32> to vector<16x32xf32>
    %20 = arith.mulf %18, %19 : vector<16x32xf32>
    %21 = vector.broadcast %1 : vector<1x32xf32> to vector<16x32xf32>
    %22 = arith.mulf %20, %21 : vector<16x32xf32>
    %23 = vector.broadcast %2 : vector<1x32xf32> to vector<16x32xf32>
    %24 = arith.addf %22, %23 : vector<16x32xf32>
    %c0_9 = arith.constant 0 : index
    %c0_10 = arith.constant 0 : index
    %25 = vector.load %arg4[%c0_9, %c0_10] : memref<2x8xf32, #tpu.memory_space<vmem>>, vector<2x8xf32>
    %c0_11 = arith.constant 0 : index
    %c0_12 = arith.constant 0 : index
    %c0_13 = arith.constant 0 : index
    %26 = vector.load %arg5[%c0_11, %c0_12, %c0_13] : memref<2x32x96xf32, #tpu.memory_space<vmem>>, vector<1x32x96xf32>
    %27 = vector.shape_cast %26 : vector<1x32x96xf32> to vector<32x96xf32>
    %cst_14 = arith.constant dense<0.000000e+00> : vector<16x96xf32>
    %28 = tpu.matmul %24, %27, %cst_14 {dimension_numbers = #tpu.dot_dimension_numbers<[1], [0], [0], [1], [0, 0, 1, 1], [], []>} : vector<16x32xf32>, vector<32x96xf32>, vector<16x96xf32> -> vector<16x96xf32>
    %c0_15 = arith.constant 0 : index
    %c0_16 = arith.constant 0 : index
    %c0_17 = arith.constant 0 : index
    %29 = vector.load %arg6[%c0_15, %c0_16, %c0_17] : memref<2x1x96xf32, #tpu.memory_space<vmem>>, vector<1x1x96xf32>
    %30 = vector.shape_cast %29 : vector<1x1x96xf32> to vector<1x96xf32>
    %31 = vector.broadcast %30 : vector<1x96xf32> to vector<16x96xf32>
    %32 = arith.addf %28, %31 : vector<16x96xf32>
    %33 = vector.extract_strided_slice %32 {offsets = [0, 0], sizes = [16, 32], strides = [1, 1]} : vector<16x96xf32> to vector<16x32xf32>
    %34 = vector.extract_strided_slice %32 {offsets = [0, 32], sizes = [16, 32], strides = [1, 1]} : vector<16x96xf32> to vector<16x32xf32>
    %35 = vector.extract_strided_slice %32 {offsets = [0, 64], sizes = [16, 32], strides = [1, 1]} : vector<16x96xf32> to vector<16x32xf32>
    %36 = vector.extract_strided_slice %25 {offsets = [0, 0], sizes = [1, 8], strides = [1, 1]} : vector<2x8xf32> to vector<1x8xf32>
    %37 = vector.extract_strided_slice %33 {offsets = [0, 0], sizes = [8, 16], strides = [1, 1]} : vector<16x32xf32> to vector<8x16xf32>
    %38 = vector.extract_strided_slice %34 {offsets = [0, 0], sizes = [8, 16], strides = [1, 1]} : vector<16x32xf32> to vector<8x16xf32>
    %39 = vector.extract_strided_slice %35 {offsets = [0, 0], sizes = [8, 16], strides = [1, 1]} : vector<16x32xf32> to vector<8x16xf32>
    "tpu.trace_start"() <{level = 10 : i32, message = "qd,kd->qk"}> : () -> ()
    %cst_18 = arith.constant dense<0.000000e+00> : vector<8x8xf32>
    %40 = tpu.matmul %37, %38, %cst_18 {dimension_numbers = #tpu.dot_dimension_numbers<[1], [1], [0], [0], [0, 0, 1, 0], [], []>} : vector<8x16xf32>, vector<8x16xf32>, vector<8x8xf32> -> vector<8x8xf32>
    "tpu.trace_stop"() : () -> ()
    %cst_19 = arith.constant 2.500000e-01 : f32
    %41 = vector.broadcast %cst_19 : f32 to vector<8x8xf32>
    %42 = arith.mulf %40, %41 : vector<8x8xf32>
    %43 = vector.broadcast %36 : vector<1x8xf32> to vector<8x8xf32>
    %44 = arith.addf %42, %43 : vector<8x8xf32>
    %cst_20 = arith.constant dense<0xFF800000> : vector<8xf32>
    %45 = vector.multi_reduction <maximumf>, %44, %cst_20 [1] : vector<8x8xf32> to vector<8xf32>
    %46 = vector.shape_cast %45 : vector<8xf32> to vector<8x1xf32>
    %47 = vector.broadcast %46 : vector<8x1xf32> to vector<8x8xf32>
    %48 = arith.subf %44, %47 : vector<8x8xf32>
    %49 = math.exp %48 : vector<8x8xf32>
    %cst_21 = arith.constant dense<0.000000e+00> : vector<8xf32>
    %50 = vector.multi_reduction <add>, %49, %cst_21 [1] : vector<8x8xf32> to vector<8xf32>
    %51 = vector.shape_cast %50 : vector<8xf32> to vector<8x1xf32>
    %52 = tpu.reciprocal %51 {approx = true} : vector<8x1xf32> -> vector<8x1xf32>
    %53 = vector.broadcast %52 : vector<8x1xf32> to vector<8x8xf32>
    %54 = arith.mulf %49, %53 : vector<8x8xf32>
    "tpu.trace_start"() <{level = 10 : i32, message = "qk,kd->qd"}> : () -> ()
    %cst_22 = arith.constant dense<0.000000e+00> : vector<8x16xf32>
    %55 = tpu.matmul %54, %39, %cst_22 {dimension_numbers = #tpu.dot_dimension_numbers<[1], [0], [0], [1], [0, 0, 1, 1], [], []>} : vector<8x8xf32>, vector<8x16xf32>, vector<8x16xf32> -> vector<8x16xf32>
    "tpu.trace_stop"() : () -> ()
    %56 = vector.extract_strided_slice %33 {offsets = [0, 16], sizes = [8, 16], strides = [1, 1]} : vector<16x32xf32> to vector<8x16xf32>
    %57 = vector.extract_strided_slice %34 {offsets = [0, 16], sizes = [8, 16], strides = [1, 1]} : vector<16x32xf32> to vector<8x16xf32>
    %58 = vector.extract_strided_slice %35 {offsets = [0, 16], sizes = [8, 16], strides = [1, 1]} : vector<16x32xf32> to vector<8x16xf32>
    "tpu.trace_start"() <{level = 10 : i32, message = "qd,kd->qk"}> : () -> ()
    %cst_23 = arith.constant dense<0.000000e+00> : vector<8x8xf32>
    %59 = tpu.matmul %56, %57, %cst_23 {dimension_numbers = #tpu.dot_dimension_numbers<[1], [1], [0], [0], [0, 0, 1, 0], [], []>} : vector<8x16xf32>, vector<8x16xf32>, vector<8x8xf32> -> vector<8x8xf32>
    "tpu.trace_stop"() : () -> ()
    %cst_24 = arith.constant 2.500000e-01 : f32
    %60 = vector.broadcast %cst_24 : f32 to vector<8x8xf32>
    %61 = arith.mulf %59, %60 : vector<8x8xf32>
    %62 = vector.broadcast %36 : vector<1x8xf32> to vector<8x8xf32>
    %63 = arith.addf %61, %62 : vector<8x8xf32>
    %cst_25 = arith.constant dense<0xFF800000> : vector<8xf32>
    %64 = vector.multi_reduction <maximumf>, %63, %cst_25 [1] : vector<8x8xf32> to vector<8xf32>
    %65 = vector.shape_cast %64 : vector<8xf32> to vector<8x1xf32>
    %66 = vector.broadcast %65 : vector<8x1xf32> to vector<8x8xf32>
    %67 = arith.subf %63, %66 : vector<8x8xf32>
    %68 = math.exp %67 : vector<8x8xf32>
    %cst_26 = arith.constant dense<0.000000e+00> : vector<8xf32>
    %69 = vector.multi_reduction <add>, %68, %cst_26 [1] : vector<8x8xf32> to vector<8xf32>
    %70 = vector.shape_cast %69 : vector<8xf32> to vector<8x1xf32>
    %71 = tpu.reciprocal %70 {approx = true} : vector<8x1xf32> -> vector<8x1xf32>
    %72 = vector.broadcast %71 : vector<8x1xf32> to vector<8x8xf32>
    %73 = arith.mulf %68, %72 : vector<8x8xf32>
    "tpu.trace_start"() <{level = 10 : i32, message = "qk,kd->qd"}> : () -> ()
    %cst_27 = arith.constant dense<0.000000e+00> : vector<8x16xf32>
    %74 = tpu.matmul %73, %58, %cst_27 {dimension_numbers = #tpu.dot_dimension_numbers<[1], [0], [0], [1], [0, 0, 1, 1], [], []>} : vector<8x8xf32>, vector<8x16xf32>, vector<8x16xf32> -> vector<8x16xf32>
    "tpu.trace_stop"() : () -> ()
    %75 = tpu.concatenate %55, %74 in 1 : vector<8x16xf32>, vector<8x16xf32> -> vector<8x32xf32>
    %76 = vector.extract_strided_slice %25 {offsets = [1, 0], sizes = [1, 8], strides = [1, 1]} : vector<2x8xf32> to vector<1x8xf32>
    %77 = vector.extract_strided_slice %33 {offsets = [8, 0], sizes = [8, 16], strides = [1, 1]} : vector<16x32xf32> to vector<8x16xf32>
    %78 = vector.extract_strided_slice %34 {offsets = [8, 0], sizes = [8, 16], strides = [1, 1]} : vector<16x32xf32> to vector<8x16xf32>
    %79 = vector.extract_strided_slice %35 {offsets = [8, 0], sizes = [8, 16], strides = [1, 1]} : vector<16x32xf32> to vector<8x16xf32>
    "tpu.trace_start"() <{level = 10 : i32, message = "qd,kd->qk"}> : () -> ()
    %cst_28 = arith.constant dense<0.000000e+00> : vector<8x8xf32>
    %80 = tpu.matmul %77, %78, %cst_28 {dimension_numbers = #tpu.dot_dimension_numbers<[1], [1], [0], [0], [0, 0, 1, 0], [], []>} : vector<8x16xf32>, vector<8x16xf32>, vector<8x8xf32> -> vector<8x8xf32>
    "tpu.trace_stop"() : () -> ()
    %cst_29 = arith.constant 2.500000e-01 : f32
    %81 = vector.broadcast %cst_29 : f32 to vector<8x8xf32>
    %82 = arith.mulf %80, %81 : vector<8x8xf32>
    %83 = vector.broadcast %76 : vector<1x8xf32> to vector<8x8xf32>
    %84 = arith.addf %82, %83 : vector<8x8xf32>
    %cst_30 = arith.constant dense<0xFF800000> : vector<8xf32>
    %85 = vector.multi_reduction <maximumf>, %84, %cst_30 [1] : vector<8x8xf32> to vector<8xf32>
    %86 = vector.shape_cast %85 : vector<8xf32> to vector<8x1xf32>
    %87 = vector.broadcast %86 : vector<8x1xf32> to vector<8x8xf32>
    %88 = arith.subf %84, %87 : vector<8x8xf32>
    %89 = math.exp %88 : vector<8x8xf32>
    %cst_31 = arith.constant dense<0.000000e+00> : vector<8xf32>
    %90 = vector.multi_reduction <add>, %89, %cst_31 [1] : vector<8x8xf32> to vector<8xf32>
    %91 = vector.shape_cast %90 : vector<8xf32> to vector<8x1xf32>
    %92 = tpu.reciprocal %91 {approx = true} : vector<8x1xf32> -> vector<8x1xf32>
    %93 = vector.broadcast %92 : vector<8x1xf32> to vector<8x8xf32>
    %94 = arith.mulf %89, %93 : vector<8x8xf32>
    "tpu.trace_start"() <{level = 10 : i32, message = "qk,kd->qd"}> : () -> ()
    %cst_32 = arith.constant dense<0.000000e+00> : vector<8x16xf32>
    %95 = tpu.matmul %94, %79, %cst_32 {dimension_numbers = #tpu.dot_dimension_numbers<[1], [0], [0], [1], [0, 0, 1, 1], [], []>} : vector<8x8xf32>, vector<8x16xf32>, vector<8x16xf32> -> vector<8x16xf32>
    "tpu.trace_stop"() : () -> ()
    %96 = vector.extract_strided_slice %33 {offsets = [8, 16], sizes = [8, 16], strides = [1, 1]} : vector<16x32xf32> to vector<8x16xf32>
    %97 = vector.extract_strided_slice %34 {offsets = [8, 16], sizes = [8, 16], strides = [1, 1]} : vector<16x32xf32> to vector<8x16xf32>
    %98 = vector.extract_strided_slice %35 {offsets = [8, 16], sizes = [8, 16], strides = [1, 1]} : vector<16x32xf32> to vector<8x16xf32>
    "tpu.trace_start"() <{level = 10 : i32, message = "qd,kd->qk"}> : () -> ()
    %cst_33 = arith.constant dense<0.000000e+00> : vector<8x8xf32>
    %99 = tpu.matmul %96, %97, %cst_33 {dimension_numbers = #tpu.dot_dimension_numbers<[1], [1], [0], [0], [0, 0, 1, 0], [], []>} : vector<8x16xf32>, vector<8x16xf32>, vector<8x8xf32> -> vector<8x8xf32>
    "tpu.trace_stop"() : () -> ()
    %cst_34 = arith.constant 2.500000e-01 : f32
    %100 = vector.broadcast %cst_34 : f32 to vector<8x8xf32>
    %101 = arith.mulf %99, %100 : vector<8x8xf32>
    %102 = vector.broadcast %76 : vector<1x8xf32> to vector<8x8xf32>
    %103 = arith.addf %101, %102 : vector<8x8xf32>
    %cst_35 = arith.constant dense<0xFF800000> : vector<8xf32>
    %104 = vector.multi_reduction <maximumf>, %103, %cst_35 [1] : vector<8x8xf32> to vector<8xf32>
    %105 = vector.shape_cast %104 : vector<8xf32> to vector<8x1xf32>
    %106 = vector.broadcast %105 : vector<8x1xf32> to vector<8x8xf32>
    %107 = arith.subf %103, %106 : vector<8x8xf32>
    %108 = math.exp %107 : vector<8x8xf32>
    %cst_36 = arith.constant dense<0.000000e+00> : vector<8xf32>
    %109 = vector.multi_reduction <add>, %108, %cst_36 [1] : vector<8x8xf32> to vector<8xf32>
    %110 = vector.shape_cast %109 : vector<8xf32> to vector<8x1xf32>
    %111 = tpu.reciprocal %110 {approx = true} : vector<8x1xf32> -> vector<8x1xf32>
    %112 = vector.broadcast %111 : vector<8x1xf32> to vector<8x8xf32>
    %113 = arith.mulf %108, %112 : vector<8x8xf32>
    "tpu.trace_start"() <{level = 10 : i32, message = "qk,kd->qd"}> : () -> ()
    %cst_37 = arith.constant dense<0.000000e+00> : vector<8x16xf32>
    %114 = tpu.matmul %113, %98, %cst_37 {dimension_numbers = #tpu.dot_dimension_numbers<[1], [0], [0], [1], [0, 0, 1, 1], [], []>} : vector<8x8xf32>, vector<8x16xf32>, vector<8x16xf32> -> vector<8x16xf32>
    "tpu.trace_stop"() : () -> ()
    %115 = tpu.concatenate %95, %114 in 1 : vector<8x16xf32>, vector<8x16xf32> -> vector<8x32xf32>
    %116 = tpu.concatenate %75, %115 in 0 : vector<8x32xf32>, vector<8x32xf32> -> vector<16x32xf32>
    %c0_38 = arith.constant 0 : index
    %c0_39 = arith.constant 0 : index
    %c0_40 = arith.constant 0 : index
    %117 = vector.load %arg7[%c0_38, %c0_39, %c0_40] : memref<2x32x32xf32, #tpu.memory_space<vmem>>, vector<1x32x32xf32>
    %118 = vector.shape_cast %117 : vector<1x32x32xf32> to vector<32x32xf32>
    %cst_41 = arith.constant dense<0.000000e+00> : vector<16x32xf32>
    %119 = tpu.matmul %116, %118, %cst_41 {dimension_numbers = #tpu.dot_dimension_numbers<[1], [0], [0], [1], [0, 0, 1, 1], [], []>} : vector<16x32xf32>, vector<32x32xf32>, vector<16x32xf32> -> vector<16x32xf32>
    %c0_42 = arith.constant 0 : index
    %c0_43 = arith.constant 0 : index
    %c0_44 = arith.constant 0 : index
    %120 = vector.load %arg8[%c0_42, %c0_43, %c0_44] : memref<2x1x32xf32, #tpu.memory_space<vmem>>, vector<1x1x32xf32>
    %121 = vector.shape_cast %120 : vector<1x1x32xf32> to vector<1x32xf32>
    %122 = vector.broadcast %121 : vector<1x32xf32> to vector<16x32xf32>
    %123 = arith.addf %119, %122 : vector<16x32xf32>
    %124 = arith.addf %24, %123 : vector<16x32xf32>
    %c0_45 = arith.constant 0 : index
    %c0_46 = arith.constant 0 : index
    %c0_47 = arith.constant 0 : index
    %125 = vector.load %arg9[%c0_45, %c0_46, %c0_47] : memref<2x1x32xf32, #tpu.memory_space<vmem>>, vector<1x1x32xf32>
    %126 = vector.shape_cast %125 : vector<1x1x32xf32> to vector<1x32xf32>
    %c0_48 = arith.constant 0 : index
    %c0_49 = arith.constant 0 : index
    %c0_50 = arith.constant 0 : index
    %127 = vector.load %arg10[%c0_48, %c0_49, %c0_50] : memref<2x1x32xf32, #tpu.memory_space<vmem>>, vector<1x1x32xf32>
    %128 = vector.shape_cast %127 : vector<1x1x32xf32> to vector<1x32xf32>
    %cst_51 = arith.constant dense<0.000000e+00> : vector<16xf32>
    %129 = vector.multi_reduction <add>, %124, %cst_51 [1] : vector<16x32xf32> to vector<16xf32>
    %130 = vector.shape_cast %129 : vector<16xf32> to vector<16x1xf32>
    %cst_52 = arith.constant 3.200000e+01 : f32
    %131 = vector.broadcast %cst_52 : f32 to vector<16x1xf32>
    %132 = arith.divf %130, %131 : vector<16x1xf32>
    %133 = vector.broadcast %132 : vector<16x1xf32> to vector<16x32xf32>
    %134 = arith.subf %124, %133 : vector<16x32xf32>
    %135 = arith.mulf %134, %134 : vector<16x32xf32>
    %cst_53 = arith.constant dense<0.000000e+00> : vector<16xf32>
    %136 = vector.multi_reduction <add>, %135, %cst_53 [1] : vector<16x32xf32> to vector<16xf32>
    %137 = vector.shape_cast %136 : vector<16xf32> to vector<16x1xf32>
    %cst_54 = arith.constant 3.200000e+01 : f32
    %138 = vector.broadcast %cst_54 : f32 to vector<16x1xf32>
    %139 = arith.divf %137, %138 : vector<16x1xf32>
    %cst_55 = arith.constant 9.99999996E-13 : f32
    %140 = vector.broadcast %cst_55 : f32 to vector<16x1xf32>
    %141 = arith.addf %139, %140 : vector<16x1xf32>
    %142 = math.rsqrt %141 : vector<16x1xf32>
    %143 = vector.broadcast %132 : vector<16x1xf32> to vector<16x32xf32>
    %144 = arith.subf %124, %143 : vector<16x32xf32>
    %145 = vector.broadcast %142 : vector<16x1xf32> to vector<16x32xf32>
    %146 = arith.mulf %144, %145 : vector<16x32xf32>
    %147 = vector.broadcast %126 : vector<1x32xf32> to vector<16x32xf32>
    %148 = arith.mulf %146, %147 : vector<16x32xf32>
    %149 = vector.broadcast %128 : vector<1x32xf32> to vector<16x32xf32>
    %150 = arith.addf %148, %149 : vector<16x32xf32>
    %c0_56 = arith.constant 0 : index
    %c0_57 = arith.constant 0 : index
    %c0_58 = arith.constant 0 : index
    %151 = vector.load %arg11[%c0_56, %c0_57, %c0_58] : memref<2x32x64xf32, #tpu.memory_space<vmem>>, vector<1x32x64xf32>
    %152 = vector.shape_cast %151 : vector<1x32x64xf32> to vector<32x64xf32>
    %cst_59 = arith.constant dense<0.000000e+00> : vector<16x64xf32>
    %153 = tpu.matmul %150, %152, %cst_59 {dimension_numbers = #tpu.dot_dimension_numbers<[1], [0], [0], [1], [0, 0, 1, 1], [], []>} : vector<16x32xf32>, vector<32x64xf32>, vector<16x64xf32> -> vector<16x64xf32>
    %c0_60 = arith.constant 0 : index
    %c0_61 = arith.constant 0 : index
    %c0_62 = arith.constant 0 : index
    %154 = vector.load %arg12[%c0_60, %c0_61, %c0_62] : memref<2x1x64xf32, #tpu.memory_space<vmem>>, vector<1x1x64xf32>
    %155 = vector.shape_cast %154 : vector<1x1x64xf32> to vector<1x64xf32>
    %156 = vector.broadcast %155 : vector<1x64xf32> to vector<16x64xf32>
    %157 = arith.addf %153, %156 : vector<16x64xf32>
    %cst_63 = arith.constant 5.000000e-01 : f32
    %158 = vector.broadcast %cst_63 : f32 to vector<16x64xf32>
    %159 = arith.mulf %158, %157 : vector<16x64xf32>
    %cst_64 = arith.constant 4.471500e-02 : f32
    %160 = vector.broadcast %cst_64 : f32 to vector<16x64xf32>
    %161 = arith.mulf %160, %157 : vector<16x64xf32>
    %162 = arith.mulf %161, %157 : vector<16x64xf32>
    %163 = arith.mulf %162, %157 : vector<16x64xf32>
    %164 = arith.addf %157, %163 : vector<16x64xf32>
    %cst_65 = arith.constant 0.797884583 : f32
    %165 = vector.broadcast %cst_65 : f32 to vector<16x64xf32>
    %166 = arith.mulf %165, %164 : vector<16x64xf32>
    %167 = math.tanh %166 : vector<16x64xf32>
    %cst_66 = arith.constant 1.000000e+00 : f32
    %168 = vector.broadcast %cst_66 : f32 to vector<16x64xf32>
    %169 = arith.addf %168, %167 : vector<16x64xf32>
    %170 = arith.mulf %159, %169 : vector<16x64xf32>
    %c0_67 = arith.constant 0 : index
    %c0_68 = arith.constant 0 : index
    %c0_69 = arith.constant 0 : index
    %171 = vector.load %arg13[%c0_67, %c0_68, %c0_69] : memref<2x64x32xf32, #tpu.memory_space<vmem>>, vector<1x64x32xf32>
    %172 = vector.shape_cast %171 : vector<1x64x32xf32> to vector<64x32xf32>
    %cst_70 = arith.constant dense<0.000000e+00> : vector<16x32xf32>
    %173 = tpu.matmul %170, %172, %cst_70 {dimension_numbers = #tpu.dot_dimension_numbers<[1], [0], [0], [1], [0, 0, 1, 1], [], []>} : vector<16x64xf32>, vector<64x32xf32>, vector<16x32xf32> -> vector<16x32xf32>
    %c0_71 = arith.constant 0 : index
    %c0_72 = arith.constant 0 : index
    %c0_73 = arith.constant 0 : index
    %174 = vector.load %arg14[%c0_71, %c0_72, %c0_73] : memref<2x1x32xf32, #tpu.memory_space<vmem>>, vector<1x1x32xf32>
    %175 = vector.shape_cast %174 : vector<1x1x32xf32> to vector<1x32xf32>
    %176 = vector.broadcast %175 : vector<1x32xf32> to vector<16x32xf32>
    %177 = arith.addf %173, %176 : vector<16x32xf32>
    %178 = arith.addf %150, %177 : vector<16x32xf32>
    %c0_74 = arith.constant 0 : index
    %c0_75 = arith.constant 0 : index
    %c0_76 = arith.constant 0 : index
    %179 = vector.load %arg15[%c0_74, %c0_75, %c0_76] : memref<2x1x32xf32, #tpu.memory_space<vmem>>, vector<1x1x32xf32>
    %180 = vector.shape_cast %179 : vector<1x1x32xf32> to vector<1x32xf32>
    %c0_77 = arith.constant 0 : index
    %c0_78 = arith.constant 0 : index
    %c0_79 = arith.constant 0 : index
    %181 = vector.load %arg16[%c0_77, %c0_78, %c0_79] : memref<2x1x32xf32, #tpu.memory_space<vmem>>, vector<1x1x32xf32>
    %182 = vector.shape_cast %181 : vector<1x1x32xf32> to vector<1x32xf32>
    %cst_80 = arith.constant dense<0.000000e+00> : vector<16xf32>
    %183 = vector.multi_reduction <add>, %178, %cst_80 [1] : vector<16x32xf32> to vector<16xf32>
    %184 = vector.shape_cast %183 : vector<16xf32> to vector<16x1xf32>
    %cst_81 = arith.constant 3.200000e+01 : f32
    %185 = vector.broadcast %cst_81 : f32 to vector<16x1xf32>
    %186 = arith.divf %184, %185 : vector<16x1xf32>
    %187 = vector.broadcast %186 : vector<16x1xf32> to vector<16x32xf32>
    %188 = arith.subf %178, %187 : vector<16x32xf32>
    %189 = arith.mulf %188, %188 : vector<16x32xf32>
    %cst_82 = arith.constant dense<0.000000e+00> : vector<16xf32>
    %190 = vector.multi_reduction <add>, %189, %cst_82 [1] : vector<16x32xf32> to vector<16xf32>
    %191 = vector.shape_cast %190 : vector<16xf32> to vector<16x1xf32>
    %cst_83 = arith.constant 3.200000e+01 : f32
    %192 = vector.broadcast %cst_83 : f32 to vector<16x1xf32>
    %193 = arith.divf %191, %192 : vector<16x1xf32>
    %cst_84 = arith.constant 9.99999996E-13 : f32
    %194 = vector.broadcast %cst_84 : f32 to vector<16x1xf32>
    %195 = arith.addf %193, %194 : vector<16x1xf32>
    %196 = math.rsqrt %195 : vector<16x1xf32>
    %197 = vector.broadcast %186 : vector<16x1xf32> to vector<16x32xf32>
    %198 = arith.subf %178, %197 : vector<16x32xf32>
    %199 = vector.broadcast %196 : vector<16x1xf32> to vector<16x32xf32>
    %200 = arith.mulf %198, %199 : vector<16x32xf32>
    %201 = vector.broadcast %180 : vector<1x32xf32> to vector<16x32xf32>
    %202 = arith.mulf %200, %201 : vector<16x32xf32>
    %203 = vector.broadcast %182 : vector<1x32xf32> to vector<16x32xf32>
    %204 = arith.addf %202, %203 : vector<16x32xf32>
    %c1 = arith.constant 1 : index
    %c0_85 = arith.constant 0 : index
    %c0_86 = arith.constant 0 : index
    %205 = vector.load %arg5[%c1, %c0_85, %c0_86] : memref<2x32x96xf32, #tpu.memory_space<vmem>>, vector<1x32x96xf32>
    %206 = vector.shape_cast %205 : vector<1x32x96xf32> to vector<32x96xf32>
    %cst_87 = arith.constant dense<0.000000e+00> : vector<16x96xf32>
    %207 = tpu.matmul %204, %206, %cst_87 {dimension_numbers = #tpu.dot_dimension_numbers<[1], [0], [0], [1], [0, 0, 1, 1], [], []>} : vector<16x32xf32>, vector<32x96xf32>, vector<16x96xf32> -> vector<16x96xf32>
    %c1_88 = arith.constant 1 : index
    %c0_89 = arith.constant 0 : index
    %c0_90 = arith.constant 0 : index
    %208 = vector.load %arg6[%c1_88, %c0_89, %c0_90] : memref<2x1x96xf32, #tpu.memory_space<vmem>>, vector<1x1x96xf32>
    %209 = vector.shape_cast %208 : vector<1x1x96xf32> to vector<1x96xf32>
    %210 = vector.broadcast %209 : vector<1x96xf32> to vector<16x96xf32>
    %211 = arith.addf %207, %210 : vector<16x96xf32>
    %212 = vector.extract_strided_slice %211 {offsets = [0, 0], sizes = [16, 32], strides = [1, 1]} : vector<16x96xf32> to vector<16x32xf32>
    %213 = vector.extract_strided_slice %211 {offsets = [0, 32], sizes = [16, 32], strides = [1, 1]} : vector<16x96xf32> to vector<16x32xf32>
    %214 = vector.extract_strided_slice %211 {offsets = [0, 64], sizes = [16, 32], strides = [1, 1]} : vector<16x96xf32> to vector<16x32xf32>
    %215 = vector.extract_strided_slice %25 {offsets = [0, 0], sizes = [1, 8], strides = [1, 1]} : vector<2x8xf32> to vector<1x8xf32>
    %216 = vector.extract_strided_slice %212 {offsets = [0, 0], sizes = [8, 16], strides = [1, 1]} : vector<16x32xf32> to vector<8x16xf32>
    %217 = vector.extract_strided_slice %213 {offsets = [0, 0], sizes = [8, 16], strides = [1, 1]} : vector<16x32xf32> to vector<8x16xf32>
    %218 = vector.extract_strided_slice %214 {offsets = [0, 0], sizes = [8, 16], strides = [1, 1]} : vector<16x32xf32> to vector<8x16xf32>
    "tpu.trace_start"() <{level = 10 : i32, message = "qd,kd->qk"}> : () -> ()
    %cst_91 = arith.constant dense<0.000000e+00> : vector<8x8xf32>
    %219 = tpu.matmul %216, %217, %cst_91 {dimension_numbers = #tpu.dot_dimension_numbers<[1], [1], [0], [0], [0, 0, 1, 0], [], []>} : vector<8x16xf32>, vector<8x16xf32>, vector<8x8xf32> -> vector<8x8xf32>
    "tpu.trace_stop"() : () -> ()
    %cst_92 = arith.constant 2.500000e-01 : f32
    %220 = vector.broadcast %cst_92 : f32 to vector<8x8xf32>
    %221 = arith.mulf %219, %220 : vector<8x8xf32>
    %222 = vector.broadcast %215 : vector<1x8xf32> to vector<8x8xf32>
    %223 = arith.addf %221, %222 : vector<8x8xf32>
    %cst_93 = arith.constant dense<0xFF800000> : vector<8xf32>
    %224 = vector.multi_reduction <maximumf>, %223, %cst_93 [1] : vector<8x8xf32> to vector<8xf32>
    %225 = vector.shape_cast %224 : vector<8xf32> to vector<8x1xf32>
    %226 = vector.broadcast %225 : vector<8x1xf32> to vector<8x8xf32>
    %227 = arith.subf %223, %226 : vector<8x8xf32>
    %228 = math.exp %227 : vector<8x8xf32>
    %cst_94 = arith.constant dense<0.000000e+00> : vector<8xf32>
    %229 = vector.multi_reduction <add>, %228, %cst_94 [1] : vector<8x8xf32> to vector<8xf32>
    %230 = vector.shape_cast %229 : vector<8xf32> to vector<8x1xf32>
    %231 = tpu.reciprocal %230 {approx = true} : vector<8x1xf32> -> vector<8x1xf32>
    %232 = vector.broadcast %231 : vector<8x1xf32> to vector<8x8xf32>
    %233 = arith.mulf %228, %232 : vector<8x8xf32>
    "tpu.trace_start"() <{level = 10 : i32, message = "qk,kd->qd"}> : () -> ()
    %cst_95 = arith.constant dense<0.000000e+00> : vector<8x16xf32>
    %234 = tpu.matmul %233, %218, %cst_95 {dimension_numbers = #tpu.dot_dimension_numbers<[1], [0], [0], [1], [0, 0, 1, 1], [], []>} : vector<8x8xf32>, vector<8x16xf32>, vector<8x16xf32> -> vector<8x16xf32>
    "tpu.trace_stop"() : () -> ()
    %235 = vector.extract_strided_slice %212 {offsets = [0, 16], sizes = [8, 16], strides = [1, 1]} : vector<16x32xf32> to vector<8x16xf32>
    %236 = vector.extract_strided_slice %213 {offsets = [0, 16], sizes = [8, 16], strides = [1, 1]} : vector<16x32xf32> to vector<8x16xf32>
    %237 = vector.extract_strided_slice %214 {offsets = [0, 16], sizes = [8, 16], strides = [1, 1]} : vector<16x32xf32> to vector<8x16xf32>
    "tpu.trace_start"() <{level = 10 : i32, message = "qd,kd->qk"}> : () -> ()
    %cst_96 = arith.constant dense<0.000000e+00> : vector<8x8xf32>
    %238 = tpu.matmul %235, %236, %cst_96 {dimension_numbers = #tpu.dot_dimension_numbers<[1], [1], [0], [0], [0, 0, 1, 0], [], []>} : vector<8x16xf32>, vector<8x16xf32>, vector<8x8xf32> -> vector<8x8xf32>
    "tpu.trace_stop"() : () -> ()
    %cst_97 = arith.constant 2.500000e-01 : f32
    %239 = vector.broadcast %cst_97 : f32 to vector<8x8xf32>
    %240 = arith.mulf %238, %239 : vector<8x8xf32>
    %241 = vector.broadcast %215 : vector<1x8xf32> to vector<8x8xf32>
    %242 = arith.addf %240, %241 : vector<8x8xf32>
    %cst_98 = arith.constant dense<0xFF800000> : vector<8xf32>
    %243 = vector.multi_reduction <maximumf>, %242, %cst_98 [1] : vector<8x8xf32> to vector<8xf32>
    %244 = vector.shape_cast %243 : vector<8xf32> to vector<8x1xf32>
    %245 = vector.broadcast %244 : vector<8x1xf32> to vector<8x8xf32>
    %246 = arith.subf %242, %245 : vector<8x8xf32>
    %247 = math.exp %246 : vector<8x8xf32>
    %cst_99 = arith.constant dense<0.000000e+00> : vector<8xf32>
    %248 = vector.multi_reduction <add>, %247, %cst_99 [1] : vector<8x8xf32> to vector<8xf32>
    %249 = vector.shape_cast %248 : vector<8xf32> to vector<8x1xf32>
    %250 = tpu.reciprocal %249 {approx = true} : vector<8x1xf32> -> vector<8x1xf32>
    %251 = vector.broadcast %250 : vector<8x1xf32> to vector<8x8xf32>
    %252 = arith.mulf %247, %251 : vector<8x8xf32>
    "tpu.trace_start"() <{level = 10 : i32, message = "qk,kd->qd"}> : () -> ()
    %cst_100 = arith.constant dense<0.000000e+00> : vector<8x16xf32>
    %253 = tpu.matmul %252, %237, %cst_100 {dimension_numbers = #tpu.dot_dimension_numbers<[1], [0], [0], [1], [0, 0, 1, 1], [], []>} : vector<8x8xf32>, vector<8x16xf32>, vector<8x16xf32> -> vector<8x16xf32>
    "tpu.trace_stop"() : () -> ()
    %254 = tpu.concatenate %234, %253 in 1 : vector<8x16xf32>, vector<8x16xf32> -> vector<8x32xf32>
    %255 = vector.extract_strided_slice %25 {offsets = [1, 0], sizes = [1, 8], strides = [1, 1]} : vector<2x8xf32> to vector<1x8xf32>
    %256 = vector.extract_strided_slice %212 {offsets = [8, 0], sizes = [8, 16], strides = [1, 1]} : vector<16x32xf32> to vector<8x16xf32>
    %257 = vector.extract_strided_slice %213 {offsets = [8, 0], sizes = [8, 16], strides = [1, 1]} : vector<16x32xf32> to vector<8x16xf32>
    %258 = vector.extract_strided_slice %214 {offsets = [8, 0], sizes = [8, 16], strides = [1, 1]} : vector<16x32xf32> to vector<8x16xf32>
    "tpu.trace_start"() <{level = 10 : i32, message = "qd,kd->qk"}> : () -> ()
    %cst_101 = arith.constant dense<0.000000e+00> : vector<8x8xf32>
    %259 = tpu.matmul %256, %257, %cst_101 {dimension_numbers = #tpu.dot_dimension_numbers<[1], [1], [0], [0], [0, 0, 1, 0], [], []>} : vector<8x16xf32>, vector<8x16xf32>, vector<8x8xf32> -> vector<8x8xf32>
    "tpu.trace_stop"() : () -> ()
    %cst_102 = arith.constant 2.500000e-01 : f32
    %260 = vector.broadcast %cst_102 : f32 to vector<8x8xf32>
    %261 = arith.mulf %259, %260 : vector<8x8xf32>
    %262 = vector.broadcast %255 : vector<1x8xf32> to vector<8x8xf32>
    %263 = arith.addf %261, %262 : vector<8x8xf32>
    %cst_103 = arith.constant dense<0xFF800000> : vector<8xf32>
    %264 = vector.multi_reduction <maximumf>, %263, %cst_103 [1] : vector<8x8xf32> to vector<8xf32>
    %265 = vector.shape_cast %264 : vector<8xf32> to vector<8x1xf32>
    %266 = vector.broadcast %265 : vector<8x1xf32> to vector<8x8xf32>
    %267 = arith.subf %263, %266 : vector<8x8xf32>
    %268 = math.exp %267 : vector<8x8xf32>
    %cst_104 = arith.constant dense<0.000000e+00> : vector<8xf32>
    %269 = vector.multi_reduction <add>, %268, %cst_104 [1] : vector<8x8xf32> to vector<8xf32>
    %270 = vector.shape_cast %269 : vector<8xf32> to vector<8x1xf32>
    %271 = tpu.reciprocal %270 {approx = true} : vector<8x1xf32> -> vector<8x1xf32>
    %272 = vector.broadcast %271 : vector<8x1xf32> to vector<8x8xf32>
    %273 = arith.mulf %268, %272 : vector<8x8xf32>
    "tpu.trace_start"() <{level = 10 : i32, message = "qk,kd->qd"}> : () -> ()
    %cst_105 = arith.constant dense<0.000000e+00> : vector<8x16xf32>
    %274 = tpu.matmul %273, %258, %cst_105 {dimension_numbers = #tpu.dot_dimension_numbers<[1], [0], [0], [1], [0, 0, 1, 1], [], []>} : vector<8x8xf32>, vector<8x16xf32>, vector<8x16xf32> -> vector<8x16xf32>
    "tpu.trace_stop"() : () -> ()
    %275 = vector.extract_strided_slice %212 {offsets = [8, 16], sizes = [8, 16], strides = [1, 1]} : vector<16x32xf32> to vector<8x16xf32>
    %276 = vector.extract_strided_slice %213 {offsets = [8, 16], sizes = [8, 16], strides = [1, 1]} : vector<16x32xf32> to vector<8x16xf32>
    %277 = vector.extract_strided_slice %214 {offsets = [8, 16], sizes = [8, 16], strides = [1, 1]} : vector<16x32xf32> to vector<8x16xf32>
    "tpu.trace_start"() <{level = 10 : i32, message = "qd,kd->qk"}> : () -> ()
    %cst_106 = arith.constant dense<0.000000e+00> : vector<8x8xf32>
    %278 = tpu.matmul %275, %276, %cst_106 {dimension_numbers = #tpu.dot_dimension_numbers<[1], [1], [0], [0], [0, 0, 1, 0], [], []>} : vector<8x16xf32>, vector<8x16xf32>, vector<8x8xf32> -> vector<8x8xf32>
    "tpu.trace_stop"() : () -> ()
    %cst_107 = arith.constant 2.500000e-01 : f32
    %279 = vector.broadcast %cst_107 : f32 to vector<8x8xf32>
    %280 = arith.mulf %278, %279 : vector<8x8xf32>
    %281 = vector.broadcast %255 : vector<1x8xf32> to vector<8x8xf32>
    %282 = arith.addf %280, %281 : vector<8x8xf32>
    %cst_108 = arith.constant dense<0xFF800000> : vector<8xf32>
    %283 = vector.multi_reduction <maximumf>, %282, %cst_108 [1] : vector<8x8xf32> to vector<8xf32>
    %284 = vector.shape_cast %283 : vector<8xf32> to vector<8x1xf32>
    %285 = vector.broadcast %284 : vector<8x1xf32> to vector<8x8xf32>
    %286 = arith.subf %282, %285 : vector<8x8xf32>
    %287 = math.exp %286 : vector<8x8xf32>
    %cst_109 = arith.constant dense<0.000000e+00> : vector<8xf32>
    %288 = vector.multi_reduction <add>, %287, %cst_109 [1] : vector<8x8xf32> to vector<8xf32>
    %289 = vector.shape_cast %288 : vector<8xf32> to vector<8x1xf32>
    %290 = tpu.reciprocal %289 {approx = true} : vector<8x1xf32> -> vector<8x1xf32>
    %291 = vector.broadcast %290 : vector<8x1xf32> to vector<8x8xf32>
    %292 = arith.mulf %287, %291 : vector<8x8xf32>
    "tpu.trace_start"() <{level = 10 : i32, message = "qk,kd->qd"}> : () -> ()
    %cst_110 = arith.constant dense<0.000000e+00> : vector<8x16xf32>
    %293 = tpu.matmul %292, %277, %cst_110 {dimension_numbers = #tpu.dot_dimension_numbers<[1], [0], [0], [1], [0, 0, 1, 1], [], []>} : vector<8x8xf32>, vector<8x16xf32>, vector<8x16xf32> -> vector<8x16xf32>
    "tpu.trace_stop"() : () -> ()
    %294 = tpu.concatenate %274, %293 in 1 : vector<8x16xf32>, vector<8x16xf32> -> vector<8x32xf32>
    %295 = tpu.concatenate %254, %294 in 0 : vector<8x32xf32>, vector<8x32xf32> -> vector<16x32xf32>
    %c1_111 = arith.constant 1 : index
    %c0_112 = arith.constant 0 : index
    %c0_113 = arith.constant 0 : index
    %296 = vector.load %arg7[%c1_111, %c0_112, %c0_113] : memref<2x32x32xf32, #tpu.memory_space<vmem>>, vector<1x32x32xf32>
    %297 = vector.shape_cast %296 : vector<1x32x32xf32> to vector<32x32xf32>
    %cst_114 = arith.constant dense<0.000000e+00> : vector<16x32xf32>
    %298 = tpu.matmul %295, %297, %cst_114 {dimension_numbers = #tpu.dot_dimension_numbers<[1], [0], [0], [1], [0, 0, 1, 1], [], []>} : vector<16x32xf32>, vector<32x32xf32>, vector<16x32xf32> -> vector<16x32xf32>
    %c1_115 = arith.constant 1 : index
    %c0_116 = arith.constant 0 : index
    %c0_117 = arith.constant 0 : index
    %299 = vector.load %arg8[%c1_115, %c0_116, %c0_117] : memref<2x1x32xf32, #tpu.memory_space<vmem>>, vector<1x1x32xf32>
    %300 = vector.shape_cast %299 : vector<1x1x32xf32> to vector<1x32xf32>
    %301 = vector.broadcast %300 : vector<1x32xf32> to vector<16x32xf32>
    %302 = arith.addf %298, %301 : vector<16x32xf32>
    %303 = arith.addf %204, %302 : vector<16x32xf32>
    %c1_118 = arith.constant 1 : index
    %c0_119 = arith.constant 0 : index
    %c0_120 = arith.constant 0 : index
    %304 = vector.load %arg9[%c1_118, %c0_119, %c0_120] : memref<2x1x32xf32, #tpu.memory_space<vmem>>, vector<1x1x32xf32>
    %305 = vector.shape_cast %304 : vector<1x1x32xf32> to vector<1x32xf32>
    %c1_121 = arith.constant 1 : index
    %c0_122 = arith.constant 0 : index
    %c0_123 = arith.constant 0 : index
    %306 = vector.load %arg10[%c1_121, %c0_122, %c0_123] : memref<2x1x32xf32, #tpu.memory_space<vmem>>, vector<1x1x32xf32>
    %307 = vector.shape_cast %306 : vector<1x1x32xf32> to vector<1x32xf32>
    %cst_124 = arith.constant dense<0.000000e+00> : vector<16xf32>
    %308 = vector.multi_reduction <add>, %303, %cst_124 [1] : vector<16x32xf32> to vector<16xf32>
    %309 = vector.shape_cast %308 : vector<16xf32> to vector<16x1xf32>
    %cst_125 = arith.constant 3.200000e+01 : f32
    %310 = vector.broadcast %cst_125 : f32 to vector<16x1xf32>
    %311 = arith.divf %309, %310 : vector<16x1xf32>
    %312 = vector.broadcast %311 : vector<16x1xf32> to vector<16x32xf32>
    %313 = arith.subf %303, %312 : vector<16x32xf32>
    %314 = arith.mulf %313, %313 : vector<16x32xf32>
    %cst_126 = arith.constant dense<0.000000e+00> : vector<16xf32>
    %315 = vector.multi_reduction <add>, %314, %cst_126 [1] : vector<16x32xf32> to vector<16xf32>
    %316 = vector.shape_cast %315 : vector<16xf32> to vector<16x1xf32>
    %cst_127 = arith.constant 3.200000e+01 : f32
    %317 = vector.broadcast %cst_127 : f32 to vector<16x1xf32>
    %318 = arith.divf %316, %317 : vector<16x1xf32>
    %cst_128 = arith.constant 9.99999996E-13 : f32
    %319 = vector.broadcast %cst_128 : f32 to vector<16x1xf32>
    %320 = arith.addf %318, %319 : vector<16x1xf32>
    %321 = math.rsqrt %320 : vector<16x1xf32>
    %322 = vector.broadcast %311 : vector<16x1xf32> to vector<16x32xf32>
    %323 = arith.subf %303, %322 : vector<16x32xf32>
    %324 = vector.broadcast %321 : vector<16x1xf32> to vector<16x32xf32>
    %325 = arith.mulf %323, %324 : vector<16x32xf32>
    %326 = vector.broadcast %305 : vector<1x32xf32> to vector<16x32xf32>
    %327 = arith.mulf %325, %326 : vector<16x32xf32>
    %328 = vector.broadcast %307 : vector<1x32xf32> to vector<16x32xf32>
    %329 = arith.addf %327, %328 : vector<16x32xf32>
    %c1_129 = arith.constant 1 : index
    %c0_130 = arith.constant 0 : index
    %c0_131 = arith.constant 0 : index
    %330 = vector.load %arg11[%c1_129, %c0_130, %c0_131] : memref<2x32x64xf32, #tpu.memory_space<vmem>>, vector<1x32x64xf32>
    %331 = vector.shape_cast %330 : vector<1x32x64xf32> to vector<32x64xf32>
    %cst_132 = arith.constant dense<0.000000e+00> : vector<16x64xf32>
    %332 = tpu.matmul %329, %331, %cst_132 {dimension_numbers = #tpu.dot_dimension_numbers<[1], [0], [0], [1], [0, 0, 1, 1], [], []>} : vector<16x32xf32>, vector<32x64xf32>, vector<16x64xf32> -> vector<16x64xf32>
    %c1_133 = arith.constant 1 : index
    %c0_134 = arith.constant 0 : index
    %c0_135 = arith.constant 0 : index
    %333 = vector.load %arg12[%c1_133, %c0_134, %c0_135] : memref<2x1x64xf32, #tpu.memory_space<vmem>>, vector<1x1x64xf32>
    %334 = vector.shape_cast %333 : vector<1x1x64xf32> to vector<1x64xf32>
    %335 = vector.broadcast %334 : vector<1x64xf32> to vector<16x64xf32>
    %336 = arith.addf %332, %335 : vector<16x64xf32>
    %cst_136 = arith.constant 5.000000e-01 : f32
    %337 = vector.broadcast %cst_136 : f32 to vector<16x64xf32>
    %338 = arith.mulf %337, %336 : vector<16x64xf32>
    %cst_137 = arith.constant 4.471500e-02 : f32
    %339 = vector.broadcast %cst_137 : f32 to vector<16x64xf32>
    %340 = arith.mulf %339, %336 : vector<16x64xf32>
    %341 = arith.mulf %340, %336 : vector<16x64xf32>
    %342 = arith.mulf %341, %336 : vector<16x64xf32>
    %343 = arith.addf %336, %342 : vector<16x64xf32>
    %cst_138 = arith.constant 0.797884583 : f32
    %344 = vector.broadcast %cst_138 : f32 to vector<16x64xf32>
    %345 = arith.mulf %344, %343 : vector<16x64xf32>
    %346 = math.tanh %345 : vector<16x64xf32>
    %cst_139 = arith.constant 1.000000e+00 : f32
    %347 = vector.broadcast %cst_139 : f32 to vector<16x64xf32>
    %348 = arith.addf %347, %346 : vector<16x64xf32>
    %349 = arith.mulf %338, %348 : vector<16x64xf32>
    %c1_140 = arith.constant 1 : index
    %c0_141 = arith.constant 0 : index
    %c0_142 = arith.constant 0 : index
    %350 = vector.load %arg13[%c1_140, %c0_141, %c0_142] : memref<2x64x32xf32, #tpu.memory_space<vmem>>, vector<1x64x32xf32>
    %351 = vector.shape_cast %350 : vector<1x64x32xf32> to vector<64x32xf32>
    %cst_143 = arith.constant dense<0.000000e+00> : vector<16x32xf32>
    %352 = tpu.matmul %349, %351, %cst_143 {dimension_numbers = #tpu.dot_dimension_numbers<[1], [0], [0], [1], [0, 0, 1, 1], [], []>} : vector<16x64xf32>, vector<64x32xf32>, vector<16x32xf32> -> vector<16x32xf32>
    %c1_144 = arith.constant 1 : index
    %c0_145 = arith.constant 0 : index
    %c0_146 = arith.constant 0 : index
    %353 = vector.load %arg14[%c1_144, %c0_145, %c0_146] : memref<2x1x32xf32, #tpu.memory_space<vmem>>, vector<1x1x32xf32>
    %354 = vector.shape_cast %353 : vector<1x1x32xf32> to vector<1x32xf32>
    %355 = vector.broadcast %354 : vector<1x32xf32> to vector<16x32xf32>
    %356 = arith.addf %352, %355 : vector<16x32xf32>
    %357 = arith.addf %329, %356 : vector<16x32xf32>
    %c1_147 = arith.constant 1 : index
    %c0_148 = arith.constant 0 : index
    %c0_149 = arith.constant 0 : index
    %358 = vector.load %arg15[%c1_147, %c0_148, %c0_149] : memref<2x1x32xf32, #tpu.memory_space<vmem>>, vector<1x1x32xf32>
    %359 = vector.shape_cast %358 : vector<1x1x32xf32> to vector<1x32xf32>
    %c1_150 = arith.constant 1 : index
    %c0_151 = arith.constant 0 : index
    %c0_152 = arith.constant 0 : index
    %360 = vector.load %arg16[%c1_150, %c0_151, %c0_152] : memref<2x1x32xf32, #tpu.memory_space<vmem>>, vector<1x1x32xf32>
    %361 = vector.shape_cast %360 : vector<1x1x32xf32> to vector<1x32xf32>
    %cst_153 = arith.constant dense<0.000000e+00> : vector<16xf32>
    %362 = vector.multi_reduction <add>, %357, %cst_153 [1] : vector<16x32xf32> to vector<16xf32>
    %363 = vector.shape_cast %362 : vector<16xf32> to vector<16x1xf32>
    %cst_154 = arith.constant 3.200000e+01 : f32
    %364 = vector.broadcast %cst_154 : f32 to vector<16x1xf32>
    %365 = arith.divf %363, %364 : vector<16x1xf32>
    %366 = vector.broadcast %365 : vector<16x1xf32> to vector<16x32xf32>
    %367 = arith.subf %357, %366 : vector<16x32xf32>
    %368 = arith.mulf %367, %367 : vector<16x32xf32>
    %cst_155 = arith.constant dense<0.000000e+00> : vector<16xf32>
    %369 = vector.multi_reduction <add>, %368, %cst_155 [1] : vector<16x32xf32> to vector<16xf32>
    %370 = vector.shape_cast %369 : vector<16xf32> to vector<16x1xf32>
    %cst_156 = arith.constant 3.200000e+01 : f32
    %371 = vector.broadcast %cst_156 : f32 to vector<16x1xf32>
    %372 = arith.divf %370, %371 : vector<16x1xf32>
    %cst_157 = arith.constant 9.99999996E-13 : f32
    %373 = vector.broadcast %cst_157 : f32 to vector<16x1xf32>
    %374 = arith.addf %372, %373 : vector<16x1xf32>
    %375 = math.rsqrt %374 : vector<16x1xf32>
    %376 = vector.broadcast %365 : vector<16x1xf32> to vector<16x32xf32>
    %377 = arith.subf %357, %376 : vector<16x32xf32>
    %378 = vector.broadcast %375 : vector<16x1xf32> to vector<16x32xf32>
    %379 = arith.mulf %377, %378 : vector<16x32xf32>
    %380 = vector.broadcast %359 : vector<1x32xf32> to vector<16x32xf32>
    %381 = arith.mulf %379, %380 : vector<16x32xf32>
    %382 = vector.broadcast %361 : vector<1x32xf32> to vector<16x32xf32>
    %383 = arith.addf %381, %382 : vector<16x32xf32>
    %384 = vector.extract_strided_slice %383 {offsets = [0, 0], sizes = [1, 32], strides = [1, 1]} : vector<16x32xf32> to vector<1x32xf32>
    %385 = vector.extract_strided_slice %383 {offsets = [8, 0], sizes = [1, 32], strides = [1, 1]} : vector<16x32xf32> to vector<1x32xf32>
    %386 = tpu.concatenate %384, %385 in 0 : vector<1x32xf32>, vector<1x32xf32> -> vector<2x32xf32>
    %c0_158 = arith.constant 0 : index
    %c0_159 = arith.constant 0 : index
    %387 = vector.load %arg17[%c0_158, %c0_159] : memref<32x32xf32, #tpu.memory_space<vmem>>, vector<32x32xf32>
    %cst_160 = arith.constant dense<0.000000e+00> : vector<2x32xf32>
    %388 = tpu.matmul %386, %387, %cst_160 {dimension_numbers = #tpu.dot_dimension_numbers<[1], [0], [0], [1], [0, 0, 1, 1], [], []>} : vector<2x32xf32>, vector<32x32xf32>, vector<2x32xf32> -> vector<2x32xf32>
    %c0_161 = arith.constant 0 : index
    %c0_162 = arith.constant 0 : index
    %389 = vector.load %arg18[%c0_161, %c0_162] : memref<1x32xf32, #tpu.memory_space<vmem>>, vector<1x32xf32>
    %390 = vector.broadcast %389 : vector<1x32xf32> to vector<2x32xf32>
    %391 = arith.addf %388, %390 : vector<2x32xf32>
    %392 = math.tanh %391 : vector<2x32xf32>
    %c0_163 = arith.constant 0 : index
    %c0_164 = arith.constant 0 : index
    %393 = vector.load %arg19[%c0_163, %c0_164] : memref<1x32xf32, #tpu.memory_space<vmem>>, vector<1x32xf32>
    %394 = vector.broadcast %393 : vector<1x32xf32> to vector<2x32xf32>
    %395 = arith.mulf %392, %394 : vector<2x32xf32>
    %cst_165 = arith.constant dense<0.000000e+00> : vector<2xf32>
    %396 = vector.multi_reduction <add>, %395, %cst_165 [1] : vector<2x32xf32> to vector<2xf32>
    %397 = vector.shape_cast %396 : vector<2xf32> to vector<2x1xf32>
    %c0_166 = arith.constant 0 : index
    %c0_167 = arith.constant 0 : index
    %398 = vector.load %arg20[%c0_166, %c0_167] : memref<1x1xf32, #tpu.memory_space<vmem>>, vector<1x1xf32>
    %399 = vector.broadcast %398 : vector<1x1xf32> to vector<2x1xf32>
    %400 = arith.addf %397, %399 : vector<2x1xf32>
    %c0_168 = arith.constant 0 : index
    %c0_169 = arith.constant 0 : index
    %401 = vector.load %arg21[%c0_168, %c0_169] : memref<2x1xf32, #tpu.memory_space<vmem>>, vector<2x1xf32>
    %402 = math.absf %400 : vector<2x1xf32>
    %cst_170 = arith.constant 0.000000e+00 : f32
    %403 = vector.broadcast %cst_170 : f32 to vector<2x1xf32>
    %404 = arith.subf %403, %402 : vector<2x1xf32>
    %405 = math.exp %404 : vector<2x1xf32>
    %cst_171 = arith.constant 1.000000e+00 : f32
    %406 = vector.broadcast %cst_171 : f32 to vector<2x1xf32>
    %407 = arith.addf %406, %405 : vector<2x1xf32>
    %408 = math.log %407 : vector<2x1xf32>
    %cst_172 = arith.constant 0.000000e+00 : f32
    %409 = vector.broadcast %cst_172 : f32 to vector<2x1xf32>
    %410 = arith.maximumf %400, %409 : vector<2x1xf32>
    %411 = arith.addf %410, %408 : vector<2x1xf32>
    %cst_173 = arith.constant 0.000000e+00 : f32
    %412 = vector.broadcast %cst_173 : f32 to vector<2x1xf32>
    %413 = arith.subf %412, %400 : vector<2x1xf32>
    %cst_174 = arith.constant 0.000000e+00 : f32
    %414 = vector.broadcast %cst_174 : f32 to vector<2x1xf32>
    %415 = arith.maximumf %413, %414 : vector<2x1xf32>
    %416 = arith.addf %415, %408 : vector<2x1xf32>
    %cst_175 = arith.constant 0.000000e+00 : f32
    %417 = vector.broadcast %cst_175 : f32 to vector<2x1xf32>
    %418 = arith.subf %417, %416 : vector<2x1xf32>
    %cst_176 = arith.constant -1.000000e+02 : f32
    %419 = vector.broadcast %cst_176 : f32 to vector<2x1xf32>
    %420 = arith.maximumf %418, %419 : vector<2x1xf32>
    %cst_177 = arith.constant 0.000000e+00 : f32
    %421 = vector.broadcast %cst_177 : f32 to vector<2x1xf32>
    %422 = arith.subf %421, %411 : vector<2x1xf32>
    %cst_178 = arith.constant -1.000000e+02 : f32
    %423 = vector.broadcast %cst_178 : f32 to vector<2x1xf32>
    %424 = arith.maximumf %422, %423 : vector<2x1xf32>
    %425 = arith.mulf %401, %420 : vector<2x1xf32>
    %cst_179 = arith.constant 1.000000e+00 : f32
    %426 = vector.broadcast %cst_179 : f32 to vector<2x1xf32>
    %427 = arith.subf %426, %401 : vector<2x1xf32>
    %428 = arith.mulf %427, %424 : vector<2x1xf32>
    %429 = arith.addf %425, %428 : vector<2x1xf32>
    %cst_180 = arith.constant 0.000000e+00 : f32
    %430 = vector.broadcast %cst_180 : f32 to vector<2x1xf32>
    %431 = arith.subf %430, %429 : vector<2x1xf32>
    %432 = vector.shape_cast %431 : vector<2x1xf32> to vector<1x2x1xf32>
    %cst_181 = arith.constant dense<0.000000e+00> : vector<1xf32>
    %433 = vector.multi_reduction <add>, %432, %cst_181 [1, 2] : vector<1x2x1xf32> to vector<1xf32>
    %434 = vector.shape_cast %433 : vector<1xf32> to vector<1x1x1xf32>
    %435 = vector.extract %434[0, 0, 0] : f32 from vector<1x1x1xf32>
    %cst_182 = arith.constant 2.000000e+00 : f32
    %436 = arith.divf %435, %cst_182 : f32
    %437 = vector.broadcast %436 : f32 to vector<1x1xf32>
    %c0_183 = arith.constant 0 : index
    %c0_184 = arith.constant 0 : index
    %438 = vector.load %arg22[%c0_183, %c0_184] : memref<1x1xf32, #tpu.memory_space<vmem>>, vector<1x1xf32>
    tpu.vector_store %arg22[%c0_183, %c0_184], %437 {strides = array<i32>} : memref<1x1xf32, #tpu.memory_space<vmem>>, vector<1x1xf32>,
    return
  }
  func.func @transform_0(%arg0: i32) -> (i32, i32) {
    %c0_i32 = arith.constant 0 : i32
    %c0_i32_0 = arith.constant 0 : i32
    %c0_i32_1 = arith.constant 0 : i32
    return %c0_i32, %c0_i32_0 : i32, i32
  }
  func.func @transform_1(%arg0: i32) -> (i32, i32) {
    %c0_i32 = arith.constant 0 : i32
    %c0_i32_0 = arith.constant 0 : i32
    %c0_i32_1 = arith.constant 0 : i32
    return %c0_i32, %c0_i32_0 : i32, i32
  }
  func.func @transform_2(%arg0: i32) -> (i32, i32) {
    %c0_i32 = arith.constant 0 : i32
    %c0_i32_0 = arith.constant 0 : i32
    %c0_i32_1 = arith.constant 0 : i32
    return %c0_i32, %c0_i32_0 : i32, i32
  }
  func.func @transform_3(%arg0: i32) -> (i32, i32) {
    %c0_i32 = arith.constant 0 : i32
    %c0_i32_0 = arith.constant 0 : i32
    %c0_i32_1 = arith.constant 0 : i32
    return %c0_i32, %c0_i32_0 : i32, i32
  }
  func.func @transform_4(%arg0: i32) -> (i32, i32, i32) {
    %c0_i32 = arith.constant 0 : i32
    %c0_i32_0 = arith.constant 0 : i32
    %c0_i32_1 = arith.constant 0 : i32
    %c0_i32_2 = arith.constant 0 : i32
    return %c0_i32, %c0_i32_0, %c0_i32_1 : i32, i32, i32
  }
  func.func @transform_5(%arg0: i32) -> (i32, i32, i32) {
    %c0_i32 = arith.constant 0 : i32
    %c0_i32_0 = arith.constant 0 : i32
    %c0_i32_1 = arith.constant 0 : i32
    %c0_i32_2 = arith.constant 0 : i32
    return %c0_i32, %c0_i32_0, %c0_i32_1 : i32, i32, i32
  }
  func.func @transform_6(%arg0: i32) -> (i32, i32, i32) {
    %c0_i32 = arith.constant 0 : i32
    %c0_i32_0 = arith.constant 0 : i32
    %c0_i32_1 = arith.constant 0 : i32
    %c0_i32_2 = arith.constant 0 : i32
    return %c0_i32, %c0_i32_0, %c0_i32_1 : i32, i32, i32
  }
  func.func @transform_7(%arg0: i32) -> (i32, i32, i32) {
    %c0_i32 = arith.constant 0 : i32
    %c0_i32_0 = arith.constant 0 : i32
    %c0_i32_1 = arith.constant 0 : i32
    %c0_i32_2 = arith.constant 0 : i32
    return %c0_i32, %c0_i32_0, %c0_i32_1 : i32, i32, i32
  }
  func.func @transform_8(%arg0: i32) -> (i32, i32, i32) {
    %c0_i32 = arith.constant 0 : i32
    %c0_i32_0 = arith.constant 0 : i32
    %c0_i32_1 = arith.constant 0 : i32
    %c0_i32_2 = arith.constant 0 : i32
    return %c0_i32, %c0_i32_0, %c0_i32_1 : i32, i32, i32
  }
  func.func @transform_9(%arg0: i32) -> (i32, i32, i32) {
    %c0_i32 = arith.constant 0 : i32
    %c0_i32_0 = arith.constant 0 : i32
    %c0_i32_1 = arith.constant 0 : i32
    %c0_i32_2 = arith.constant 0 : i32
    return %c0_i32, %c0_i32_0, %c0_i32_1 : i32, i32, i32
  }
  func.func @transform_10(%arg0: i32) -> (i32, i32, i32) {
    %c0_i32 = arith.constant 0 : i32
    %c0_i32_0 = arith.constant 0 : i32
    %c0_i32_1 = arith.constant 0 : i32
    %c0_i32_2 = arith.constant 0 : i32
    return %c0_i32, %c0_i32_0, %c0_i32_1 : i32, i32, i32
  }
  func.func @transform_11(%arg0: i32) -> (i32, i32, i32) {
    %c0_i32 = arith.constant 0 : i32
    %c0_i32_0 = arith.constant 0 : i32
    %c0_i32_1 = arith.constant 0 : i32
    %c0_i32_2 = arith.constant 0 : i32
    return %c0_i32, %c0_i32_0, %c0_i32_1 : i32, i32, i32
  }
  func.func @transform_12(%arg0: i32) -> (i32, i32, i32) {
    %c0_i32 = arith.constant 0 : i32
    %c0_i32_0 = arith.constant 0 : i32
    %c0_i32_1 = arith.constant 0 : i32
    %c0_i32_2 = arith.constant 0 : i32
    return %c0_i32, %c0_i32_0, %c0_i32_1 : i32, i32, i32
  }
  func.func @transform_13(%arg0: i32) -> (i32, i32, i32) {
    %c0_i32 = arith.constant 0 : i32
    %c0_i32_0 = arith.constant 0 : i32
    %c0_i32_1 = arith.constant 0 : i32
    %c0_i32_2 = arith.constant 0 : i32
    return %c0_i32, %c0_i32_0, %c0_i32_1 : i32, i32, i32
  }
  func.func @transform_14(%arg0: i32) -> (i32, i32, i32) {
    %c0_i32 = arith.constant 0 : i32
    %c0_i32_0 = arith.constant 0 : i32
    %c0_i32_1 = arith.constant 0 : i32
    %c0_i32_2 = arith.constant 0 : i32
    return %c0_i32, %c0_i32_0, %c0_i32_1 : i32, i32, i32
  }
  func.func @transform_15(%arg0: i32) -> (i32, i32, i32) {
    %c0_i32 = arith.constant 0 : i32
    %c0_i32_0 = arith.constant 0 : i32
    %c0_i32_1 = arith.constant 0 : i32
    %c0_i32_2 = arith.constant 0 : i32
    return %c0_i32, %c0_i32_0, %c0_i32_1 : i32, i32, i32
  }
  func.func @transform_16(%arg0: i32) -> (i32, i32) {
    %c0_i32 = arith.constant 0 : i32
    %c0_i32_0 = arith.constant 0 : i32
    %c0_i32_1 = arith.constant 0 : i32
    return %c0_i32, %c0_i32_0 : i32, i32
  }
  func.func @transform_17(%arg0: i32) -> (i32, i32) {
    %c0_i32 = arith.constant 0 : i32
    %c0_i32_0 = arith.constant 0 : i32
    %c0_i32_1 = arith.constant 0 : i32
    return %c0_i32, %c0_i32_0 : i32, i32
  }
  func.func @transform_18(%arg0: i32) -> (i32, i32) {
    %c0_i32 = arith.constant 0 : i32
    %c0_i32_0 = arith.constant 0 : i32
    %c0_i32_1 = arith.constant 0 : i32
    return %c0_i32, %c0_i32_0 : i32, i32
  }
  func.func @transform_19(%arg0: i32) -> (i32, i32) {
    %c0_i32 = arith.constant 0 : i32
    %c0_i32_0 = arith.constant 0 : i32
    %c0_i32_1 = arith.constant 0 : i32
    return %c0_i32, %c0_i32_0 : i32, i32
  }
  func.func @transform_20(%arg0: i32) -> (i32, i32) {
    %c0_i32 = arith.constant 0 : i32
    %c0_i32_0 = arith.constant 0 : i32
    %c0_i32_1 = arith.constant 0 : i32
    return %c0_i32, %c0_i32_0 : i32, i32
  }
  func.func @transform_21(%arg0: i32) -> (i32, i32) {
    %c0_i32 = arith.constant 0 : i32
    %c0_i32_0 = arith.constant 0 : i32
    %c0_i32_1 = arith.constant 0 : i32
    return %c0_i32, %c0_i32_0 : i32, i32
  }
}

</mosaic_0001>

<bundles_post_ra>
// kernel: tpu_custom_call.1
= control target key start
LH: loop header
LB: loop body
LE: loop exit
PB: predicated region body
PF: predicated region fallthrough
CT: control target
= control target key end

     0   :  { %s3991_s0 = inlined_call_operand.hbm [shape: f32[16,32], index: 0, kind: input, shape index: {}]   ;;  %s3992_s1 = inlined_call_operand.hbm [shape: f32[1,32], index: 1, kind: input, shape index: {}]   ;;  %s3993_s2 = inlined_call_operand.hbm [shape: f32[1,32], index: 2, kind: input, shape index: {}]   ;;  %s3994_s3 = inlined_call_operand.vmem [shape: f32[2,8], index: 3, kind: input, shape index: {}]   ;;  %s3995_s4 = inlined_call_operand.vmem [shape: f32[2,32,96], index: 4, kind: input, shape index: {}]   ;;  %s3996_s5 = inlined_call_operand.hbm [shape: f32[2,1,96], index: 5, kind: input, shape index: {}]   ;;  %s3997_s6 = inlined_call_operand.vmem [shape: f32[2,32,32], index: 6, kind: input, shape index: {}]   ;;  %s3998_s7 = inlined_call_operand.hbm [shape: f32[2,1,32], index: 7, kind: input, shape index: {}]   ;;  %s3999_s8 = inlined_call_operand.vmem [shape: f32[2,1,32], index: 8, kind: input, shape index: {}]   ;;  %s4000_s9 = inlined_call_operand.vmem [shape: f32[2,1,32], index: 9, kind: input, shape index: {}]   ;;  %s4001_s10 = inlined_call_operand.vmem [shape: f32[2,32,64], index: 10, kind: input, shape index: {}]   ;;  %s4002_s11 = inlined_call_operand.vmem [shape: f32[2,1,64], index: 11, kind: input, shape index: {}]   ;;  %s4003_s12 = inlined_call_operand.vmem [shape: f32[2,64,32], index: 12, kind: input, shape index: {}]   ;;  %s4004_s13 = inlined_call_operand.vmem [shape: f32[2,1,32], index: 13, kind: input, shape index: {}]   ;;  %s4005_s14 = inlined_call_operand.vmem [shape: f32[2,1,32], index: 14, kind: input, shape index: {}]   ;;  %s4006_s15 = inlined_call_operand.vmem [shape: f32[2,1,32], index: 15, kind: input, shape index: {}]   ;;  %s4007_s16 = inlined_call_operand.vmem [shape: f32[32,32], index: 16, kind: input, shape index: {}]   ;;  %s4008_s17 = inlined_call_operand.vmem [shape: f32[1,32], index: 17, kind: input, shape index: {}]   ;;  %s4009_s18 = inlined_call_operand.vmem [shape: f32[1,32], index: 18, kind: input, shape index: {}]   ;;  %s4010_s19 = inlined_call_operand.<no memory space> [shape: f32[1,1], index: 19, kind: input, shape index: {}]   ;;  %s4011_s20 = inlined_call_operand.vmem [shape: f32[2,1], index: 20, kind: input, shape index: {}]   ;;  %s4012_s21 = inlined_call_operand.hbm [shape: f32[1,1], index: 21, kind: output, shape index: {}]  }
   0x1   :  { %4022 = sst [smem:[#allocation17_spill]] %s3991_s0  ;;  %v26_v0 = vstv %s4010_s19 }
   0x2   :  { %4023 = sst [smem:[#allocation18_spill]] %s3992_s1  ;;  %27 = vst [vmem:[#allocation2] sm:$0x1] %v26_v0 }
   0x3   :  { %4024 = sst [smem:[#allocation19_spill]] %s3993_s2 }
   0x4   :  { %4025 = sst [smem:[#allocation20_spill]] %s3994_s3 }
   0x5   :  { %4026 = sst [smem:[#allocation21_spill]] %s3995_s4 }
   0x6   :  { %4027 = sst [smem:[#allocation22_spill]] %s3996_s5 }
   0x7   :  { %4028 = sst [smem:[#allocation23_spill]] %s4011_s20 }
   0x8   :  { %4029 = sst [smem:[#allocation24_spill]] %s4012_s21 }
   0x9   :  { %28 = vsyncpa [#allocation4], 0 }
   0xa   :  { %29 = vsyncpa [#allocation7], 0 }
   0xb   :  { %30 = vsyncpa [#allocation10], 0 }
   0xc   :  { %31 = vsyncpa [#allocation5], 0  ;;  %s3377_s26 = smov [#allocation6]   ;;  %s3378_s3 = smov [#allocation9]  }
   0xd   :  { %s50_s27 = sshll.u32 %s3377_s26, 4  ;;  %s73_s28 = sshll.u32 %s3378_s3, 4  ;;  %s51_s27 = int_to_ptr.vmem [resolvable:$true] %s50_s27  ;;  %s3508_s28 = int_to_ptr.vmem [resolvable:$true] %s73_s28 }
   0xe   :  { %s4030_s4 = sld [smem:[#allocation18_spill]] }
  0x14   :  { %s3237_s30 = scalar_lea.hbm %s4030_s4, 16 }
  0x15   :  { %p3238_p0 = scmp.ne.s32.totalorder %s4030_s4, %s3237_s30  ;;  %p3241_p1 = scmp.lt.u32.totalorder %s3237_s30, %s4030_s4 }
  0x17   :  { %p3243_p2 = pnand %p3241_p1, %p3238_p0 }
  0x19   :  { %3246 = shalt.err (!%p3243_p2)
}
  0x1a   :  { %s3247_s1 = scalar_lea.vmem %s51_s27, 16  ;;  %s3251_s24 = scalar_lea.vmem %s51_s27, 32 }
  0x1b   :  { %p3248_p3 = scmp.ne.s32.totalorder %s51_s27, %s3247_s1  ;;  %p3252_p4 = scmp.lt.s32.totalorder %s51_s27, %s51_s27 }
  0x1c   :  { %p3253_p5 = scmp.lt.s32.totalorder %s3251_s24, %s3247_s1 }
  0x1e   :  { %p3254_p6 = por %p3253_p5, %p3252_p4 }
  0x20   :  { %p3255_p7 = pnand %p3254_p6, %p3248_p3 }
  0x22   :  { %3258 = shalt.err (!%p3255_p7)
}
  0x23   :  { %53 = dma.hbm_to_vmem [thread:$0]  %s4030_s4, 16, %s51_s27, [#allocation7]  }
  0x24   :  { %s4031_s29 = sld [smem:[#allocation22_spill]] }
  0x2a   :  { %s3259_s0 = scalar_lea.hbm %s4031_s29, 32 }
  0x2b   :  { %p3260_p8 = scmp.ne.s32.totalorder %s4031_s29, %s3259_s0  ;;  %p3263_p9 = scmp.lt.u32.totalorder %s3259_s0, %s4031_s29 }
  0x2d   :  { %p3265_p10 = pnand %p3263_p9, %p3260_p8 }
  0x2f   :  { %3268 = shalt.err (!%p3265_p10)
}
  0x30   :  { %s3269_s23 = scalar_lea.vmem %s3508_s28, 32  ;;  %p3274_p12 = scmp.lt.s32.totalorder %s3508_s28, %s3508_s28 }
  0x31   :  { %p3270_p11 = scmp.ne.s32.totalorder %s3508_s28, %s3269_s23  ;;  %p3275_p13 = scmp.lt.s32.totalorder %s3269_s23, %s3269_s23 }
  0x33   :  { %p3276_p0 = por %p3275_p13, %p3274_p12 }
  0x35   :  { %p3277_p1 = pnand %p3276_p0, %p3270_p11 }
  0x37   :  { %3280 = shalt.err (!%p3277_p1)
}
  0x38   :  { %s4019_s27 = smov 16   ;;  %s4021_s4 = smov 1  }
  0x39   :  { %79 = dma.hbm_to_vmem [thread:$0]  %s4031_s29, 32, %s3508_s28, [#allocation10], %s4019_s27, %s4019_s27, %s4021_s4  }
  0x3a   :  { %s3381_s2 = smov [#allocation3]   ;;  %s4032_s0 = sld [smem:[#allocation17_spill]] }
  0x3b   :  { %s37_s25 = sshll.u32 %s3381_s2, 4  ;;  %s38_s25 = int_to_ptr.vmem [resolvable:$true] %s37_s25 }
  0x40   :  { %s3281_s5 = scalar_lea.hbm %s4032_s0, 256 }
  0x41   :  { %p3282_p2 = scmp.ne.s32.totalorder %s4032_s0, %s3281_s5  ;;  %p3285_p3 = scmp.lt.u32.totalorder %s3281_s5, %s4032_s0 }
  0x43   :  { %p3287_p4 = pnand %p3285_p3, %p3282_p2 }
  0x45   :  { %3290 = shalt.err (!%p3287_p4)
}
  0x46   :  { %s3291_s21 = scalar_lea.vmem %s38_s25, 256  ;;  %p3296_p6 = scmp.lt.s32.totalorder %s38_s25, %s38_s25 }
  0x47   :  { %p3292_p5 = scmp.ne.s32.totalorder %s38_s25, %s3291_s21  ;;  %p3297_p7 = scmp.lt.s32.totalorder %s3291_s21, %s3291_s21 }
  0x49   :  { %p3298_p8 = por %p3297_p7, %p3296_p6 }
  0x4b   :  { %p3299_p9 = pnand %p3298_p8, %p3292_p5 }
  0x4d   :  { %3302 = shalt.err (!%p3299_p9)
}
  0x4e   :  { %s3382_s28 = smov 128   ;;  %s3383_s29 = smov 8  }
  0x4f   :  { %43 = dma.hbm_to_vmem [thread:$0]  %s4032_s0, 256, %s38_s25, [#allocation4], %s3382_s28, %s3382_s28, %s3383_s29  }
  0x50   :  { %s3384_s2 = smov [#allocation8]   ;;  %s3385_s3 = smov [#allocation11]  }
  0x51   :  { %s60_s26 = sshll.u32 %s3384_s2, 4  ;;  %s87_s5 = sshll.u32 %s3385_s3, 4  ;;  %s61_s26 = int_to_ptr.vmem [resolvable:$true] %s60_s26  ;;  %s88_s5 = int_to_ptr.vmem [resolvable:$true] %s87_s5 }
  0x52   :  { %s4033_s19 = sld [smem:[#allocation19_spill]] }
  0x58   :  { %s3303_s23 = scalar_lea.hbm %s4033_s19, 16 }
  0x59   :  { %p3304_p10 = scmp.ne.s32.totalorder %s4033_s19, %s3303_s23  ;;  %p3307_p11 = scmp.lt.u32.totalorder %s3303_s23, %s4033_s19 }
  0x5b   :  { %p3309_p12 = pnand %p3307_p11, %p3304_p10 }
  0x5d   :  { %3312 = shalt.err (!%p3309_p12)
}
  0x5e   :  { %s3313_s25 = scalar_lea.vmem %s61_s26, 16  ;;  %s3317_s0 = scalar_lea.vmem %s61_s26, 32 }
  0x5f   :  { %p3314_p13 = scmp.ne.s32.totalorder %s61_s26, %s3313_s25  ;;  %p3318_p0 = scmp.lt.s32.totalorder %s61_s26, %s61_s26 }
  0x60   :  { %p3319_p1 = scmp.lt.s32.totalorder %s3317_s0, %s3313_s25 }
  0x62   :  { %p3320_p2 = por %p3319_p1, %p3318_p0 }
  0x64   :  { %p3321_p3 = pnand %p3320_p2, %p3314_p13 }
  0x66   :  { %3324 = shalt.err (!%p3321_p3)
}
  0x67   :  { %63 = dma.hbm_to_vmem [thread:$0]  %s4033_s19, 16, %s61_s26, [#allocation7]  }
  0x68   :  { %s3325_s20 = scalar_lea.hbm %s3998_s7, 32 }
  0x69   :  { %p3326_p4 = scmp.ne.s32.totalorder %s3998_s7, %s3325_s20  ;;  %p3329_p5 = scmp.lt.u32.totalorder %s3325_s20, %s3998_s7 }
  0x6b   :  { %p3331_p6 = pnand %p3329_p5, %p3326_p4 }
  0x6d   :  { %3334 = shalt.err (!%p3331_p6)
}
  0x6e   :  { %s3335_s30 = scalar_lea.vmem %s88_s5, 32  ;;  %p3340_p8 = scmp.lt.s32.totalorder %s88_s5, %s88_s5 }
  0x6f   :  { %p3336_p7 = scmp.ne.s32.totalorder %s88_s5, %s3335_s30  ;;  %p3341_p9 = scmp.lt.s32.totalorder %s3335_s30, %s3335_s30 }
  0x71   :  { %p3342_p10 = por %p3341_p9, %p3340_p8 }
  0x73   :  { %p3343_p11 = pnand %p3342_p10, %p3336_p7 }
  0x75   :  { %3346 = shalt.err (!%p3343_p11)
}
  0x76   :  { %s4034_s26 = smov 1   ;;  %s4035_s22 = smov 16  }
  0x77   :  { %93 = dma.hbm_to_vmem [thread:$0]  %s3998_s7, 32, %s88_s5, [#allocation10], %s4035_s22, %s4035_s22, %s4034_s26  }
  0x78   :  { %3369 = dma.done.wait [#allocation4], 256  }
  0x79   :  { %3370 = vsyncadd [#allocation4], 4294967040 }
  0x7a   :  { %3371 = dma.done.wait [#allocation7], 32  }
  0x7b   :  { %3372 = vsyncadd [#allocation7], 4294967264 }
  0x7c   :  { %3373 = dma.done.wait [#allocation10], 64  }
  0x7d   :  { %3374 = vsyncadd [#allocation10], 4294967232  ;;  %vm139_vm0 = vcmask 261120   ;;  %v135_v1 = vld [vmem:[#allocation3] sm:$0xff]  ;;  %v136_v2 = vld [vmem:[#allocation3 + $0x8] sm:$0xff]  ;;  %s4036_s21 = sld [smem:[#allocation21_spill]]  ;;  %v355_v46 = vlaneseq }
  0x7e   :  { %v140_v3 = vsel %vm139_vm0, %v135_v1, 0.0  ;;  %v143_v4 = vsel %vm139_vm0, %v136_v2, 0.0  ;;  %v2689_v28 = vld [vmem:[#allocation6] ss:$0 sm:$0xff]  ;;  %v2690_v30 = vld [vmem:[#allocation8] ss:$0 sm:$0xff] }
  0x7f   :  { %141 = vadd.xlane.f32.xlu0 %v140_v3  ;;  %v3386_v37 = vmov 0.0   ;;  %vm3387_vm1 = vmmov 0   ;;  %v2691_v38 = vld [vmem:[#allocation9] ss:$0 sm:$0xff]  ;;  %s3388_s20 = smov 96   ;;  %s3389_s4 = smov 80  }
  0x80   :  { %2881 = vmatprep.subr.mxu1 %v3386_v37  ;;  %2883 = vmatprep.mubr.msk.f32.mxu1 %vm3387_vm1, %v3386_v37  ;;  %s3390_s24 = smov 112   ;;  %vm279_vm2 = vcmask 130048   ;;  %v356_v47 = vshrl.u32 %v355_v46, 7  ;;  %s4037_s30 = sld [smem:[#allocation20_spill]]  ;;  %vm360_vm3 = vcmask 64512   ;;  %vm1225_vm4 = vcmask 523264  }
  0x81   :  { %s3391_s26 = smov 64   ;;  %s3392_s19 = smov 48   ;;  %vm2526_vm5 = vcmask 1040384   ;;  %vm2621_vm6 = vcmask 254976   ;;  %vm2655_vm7 = vcmask 1024   ;;  %vm2670_vm8 = vcmask 0  }
  0x82   :  { %v357_v48 = vsub.s32 0, %v356_v47  ;;  %v700_v55 = vsub.s32 1, %v356_v47  ;;  %s3394_s25 = smov [#allocation12]  }
  0x83   :  { %144 = vadd.xlane.f32.xlu0 %v143_v4  ;;  %v184_v15 = vld [vmem:[%s4036_s21] sm:$0xff]  ;;  %v185_v16 = vld [vmem:[%s4036_s21 + $0x8] sm:$0xff]  ;;  %v186_v17 = vld [vmem:[%s4036_s21 + $0x10] sm:$0xff]  ;;  %s2678_s0 = sshll.u32 %s3394_s25, 4  ;;  %s2679_s0 = int_to_ptr.vmem [resolvable:$true] %s2678_s0 }
  0x84   :  { %v3065_v18 = vpack.c.bf16 %v185_v16, %v184_v15  ;;  %v187_v19 = vld [vmem:[%s4036_s21 + $0x18] sm:$0xff]  ;;  %s3351_s29 = scalar_lea.vmem %s2679_s0, 32  ;;  %p3352_p13 = scmp.lt.s32.totalorder %s2679_s0, %s2679_s0 }
  0x85   :  { %v3069_v20 = vpack.c.bf16 %v187_v19, %v186_v17 }
  0x86   :  { %3066 = vmatprep.subr.bf16.mxu0 %v3065_v18  ;;  %v183_v49 = vld [vmem:[%s4037_s30] sm:$0x3] }
  0x87   :  { %3068 = vmatpush3.bf16.msra.mxu0 %v3065_v18  ;;  %v3638_v50 = vrot.slane %v183_v49, %v357_v48  ;;  %v3642_v57 = vrot.slane %v183_v49, %v700_v55  ;;  %v963_v55 = vld [vmem:[%s3997_s6 + $0x8] sm:$0xff] }
  0x88   :  { %3070 = vmatprep.subr.bf16.mxu0 %v3069_v20 }
  0x8b   :  { %3072 = vmatpush3.bf16.msra.mxu0 %v3069_v20 }
  0x8c   :  { %2901 = vmatprep.subr.mxu0 %v3386_v37 }
 0x10c   :  { %v142_v5 = vpop.xlane.xlu0 %141 }
 0x10d   :  { %v147_v6 = vmul.f32 0.03125, %v142_v5 }
 0x10f   :  { %v149_v7 = vsub.f32 %v135_v1, %v147_v6 }
 0x110   :  { %v145_v8 = vpop.xlane.xlu0 %144 }
 0x111   :  { %v148_v9 = vmul.f32 0.03125, %v145_v8  ;;  %v151_v10 = vmul.f32 %v149_v7, %v149_v7 }
 0x113   :  { %v150_v11 = vsub.f32 %v136_v2, %v148_v9  ;;  %v153_v12 = vsel %vm139_vm0, %v151_v10, 0.0 }
 0x114   :  { %154 = vadd.xlane.f32.xlu1 %v153_v12 }
 0x115   :  { %v152_v13 = vmul.f32 %v150_v11, %v150_v11 }
 0x117   :  { %v156_v14 = vsel %vm139_vm0, %v152_v13, 0.0 }
 0x118   :  { %157 = vadd.xlane.f32.xlu1 %v156_v14 }
 0x1a1   :  { %v155_v21 = vpop.xlane.xlu1 %154 }
 0x1a2   :  { %v159_v22 = vmul.f32 0.03125, %v155_v21 }
 0x1a4   :  { %v161_v23 = vadd.f32 1e-12, %v159_v22 }
 0x1a5   :  { %v158_v24 = vpop.xlane.xlu1 %157 }
 0x1a6   :  { %3171 = vrsqrt.f32 %v161_v23  ;;  %v160_v25 = vmul.f32 0.03125, %v158_v24 }
 0x1a8   :  { %v162_v26 = vadd.f32 1e-12, %v160_v25 }
 0x1aa   :  { %3173 = vrsqrt.f32 %v162_v26 }
 0x1b0   :  { %v3172_v27 = vpop.eup %3171 }
 0x1b1   :  { %v165_v29 = vmul.f32 %v3172_v27, %v149_v7 }
 0x1b3   :  { %v173_v31 = vmul.f32 %v2689_v28, %v165_v29 }
 0x1b4   :  { %v3174_v32 = vpop.eup %3173 }
 0x1b5   :  { %v166_v33 = vmul.f32 %v3174_v32, %v150_v11  ;;  %v3597_v34 = vadd.f32 %v2690_v30, %v173_v31 }
 0x1b7   :  { %v174_v35 = vmul.f32 %v2689_v28, %v166_v33  ;;  %2878 = vmatprep.mubr.msk.f32.mxu0 %vm139_vm0, %v3597_v34 }
 0x1b9   :  { %v3601_v36 = vadd.f32 %v2690_v30, %v174_v35 }
 0x1bb   :  { %2879 = vmatmul.mubr.msk.f32.vlgmr.msra.gmra.mrb[0].mxu0 %vm139_vm0, %v3601_v36 }
 0x1bc   :  { %2903 = vmatprep.mubr.msk.f32.mxu0 %vm3387_vm1, %v3386_v37 }
 0x28e   :  { %v2880_v39 = vpop.f32.mrb[0].mxu0 }
 0x28f   :  { %v267_v40 = vpop.f32.mrb[1].mxu0  ;;  %v3617_v42 = vadd.f32 %v2880_v39, %v2691_v38 }
 0x290   :  { %v3611_v41 = vadd.f32 %v2691_v38, %v267_v40 }
 0x292   :  { %277 = vrot.lane.b32.xlu0 %v3611_v41, %s3388_s20 }
 0x296   :  { %450 = vrot.lane.b32.xlu0 %v3611_v41, %s3389_s4 }
 0x29a   :  { %621 = vrot.lane.b32.xlu0 %v3617_v42, %s3388_s20 }
 0x29e   :  { %790 = vrot.lane.b32.xlu0 %v3617_v42, %s3390_s24 }
 0x304   :  { %v278_v43 = vpop.permute.xlu0 %277 }
 0x305   :  { %2882 = vmatpush3.xpose.msk.msra.mxu1 %vm279_vm2, %v278_v43 }
 0x306   :  { %2886 = vmatprep.subr.mxu1 %v3386_v37 }
 0x308   :  { %2884 = vmatmul.mubr.msk.f32.vlgmr.msra.gmra.mrb[0].mxu1 %vm279_vm2, %v3611_v41  ;;  %v451_v44 = vpop.permute.xlu0 %450 }
 0x309   :  { %2888 = vmatprep.mubr.msk.f32.mxu1 %vm3387_vm1, %v3386_v37 }
 0x30c   :  { %v622_v45 = vpop.permute.xlu0 %621 }
 0x30d   :  { %2902 = vmatpush3.xpose.msk.msra.mxu0 %vm279_vm2, %v622_v45 }
 0x30e   :  { %2911 = vmatprep.subr.mxu0 %v3386_v37 }
 0x310   :  { %2904 = vmatmul.mubr.msk.f32.vlgmr.msra.gmra.mrb[2].mxu0 %vm279_vm2, %v3617_v42  ;;  %v791_v8 = vpop.permute.xlu0 %790 }
 0x311   :  { %2913 = vmatprep.mubr.msk.f32.mxu0 %vm3387_vm1, %v3386_v37 }
 0x3db   :  { %v350_v51 = vpop.f32.mrb[0].mxu1 }
 0x3dc   :  { %v354_v52 = vmul.f32 0.25, %v350_v51  ;;  %v2885_v53 = vpop.f32.mrb[1].mxu1 }
 0x3de   :  { %v359_v54 = vadd.f32 %v3638_v50, %v354_v52 }
 0x3e0   :  { %v361_v56 = vsel %vm360_vm3, %v359_v54, -inf }
 0x3e1   :  { %362 = vmax.xlane.f32.xlu1 %v361_v56 }
 0x3e3   :  { %v693_v58 = vpop.f32.mrb[2].mxu0 }
 0x3e4   :  { %v697_v59 = vmul.f32 0.25, %v693_v58  ;;  %v2905_v60 = vpop.f32.mrb[3].mxu0  ;;  %v964_v58 = vld [vmem:[%s3997_s6 + $0x10] sm:$0xff] }
 0x3e6   :  { %v702_v61 = vadd.f32 %v3642_v57, %v697_v59  ;;  %v965_v59 = vld [vmem:[%s3997_s6 + $0x18] sm:$0xff] }
 0x3e7   :  { %v3077_v60 = vpack.c.bf16 %v965_v59, %v964_v58  ;;  %v1215_v58 = vld [vmem:[%s4003_s12 + $0x28] sm:$0xff] }
 0x3e8   :  { %v703_v62 = vsel %vm360_vm3, %v702_v61, -inf }
 0x3e9   :  { %704 = vmax.xlane.f32.xlu0 %v703_v62 }
 0x3f2   :  { %372 = vrot.lane.b32.xlu1 %v3611_v41, %s3391_s26 }
 0x3f6   :  { %448 = vrot.lane.b32.xlu1 %v3611_v41, %s3390_s24 }
 0x46e   :  { %v363_v63 = vpop.xlane.xlu1 %362 }
 0x46f   :  { %v364_v0 = vsub.f32 %v359_v54, %v363_v63  ;;  %v962_v54 = vld [vmem:[%s3997_s6] sm:$0xff] }
 0x470   :  { %v3073_v56 = vpack.c.bf16 %v963_v55, %v962_v54  ;;  %v1213_v54 = vld [vmem:[%s4003_s12 + $0x18] sm:$0xff] }
 0x471   :  { %v365_v1 = vmul.f32 1.442695, %v364_v0 }
 0x472   :  { %v373_v2 = vpop.permute.xlu1 %372 }
 0x473   :  { %3175 = vpow2.f32 %v365_v1  ;;  %2887 = vmatpush3.msra.mxu1 %v373_v2 }
 0x474   :  { %2891 = vmatprep.subr.mxu1 %v3386_v37 }
 0x476   :  { %v449_v5 = vpop.permute.xlu1 %448  ;;  %v705_v11 = vpop.xlane.xlu0 %704 }
 0x477   :  { %v706_v12 = vsub.f32 %v702_v61, %v705_v11 }
 0x479   :  { %v707_v16 = vmul.f32 1.442695, %v706_v12 }
 0x47d   :  { %v3176_v3 = vpop.eup %3175 }
 0x47e   :  { %v367_v4 = vsel %vm360_vm3, %v3176_v3, 0.0 }
 0x47f   :  { %368 = vadd.xlane.f32.xlu1 %v367_v4 }
 0x490   :  { %792 = vrot.lane.b32.xlu1 %v3617_v42, %s3389_s4 }
 0x50c   :  { %v369_v6 = vpop.xlane.xlu1 %368 }
 0x50d   :  { %3177 = vrcp.f32 %v369_v6 }
 0x50e   :  { %3179 = vpow2.f32 %v707_v16 }
 0x510   :  { %v793_v7 = vpop.permute.xlu1 %792 }
 0x511   :  { %2912 = vmatpush3.xpose.msk.msra.mxu0 %vm279_vm2, %v793_v7  ;;  %v2706_v7 = vld [vmem:[#allocation11] ss:$0 sm:$0xff] }
 0x512   :  { %3074 = vmatprep.subr.bf16.mxu0 %v3073_v56 }
 0x514   :  { %2914 = vmatmul.mubr.msk.f32.vlgmr.msra.gmra.mrb[4].mxu0 %vm279_vm2, %v791_v8 }
 0x515   :  { %3076 = vmatpush3.bf16.msra.mxu0 %v3073_v56  ;;  %v1214_v56 = vld [vmem:[%s4003_s12 + $0x20] sm:$0xff] }
 0x516   :  { %3078 = vmatprep.subr.bf16.mxu0 %v3077_v60  ;;  %v3097_v59 = vpack.c.bf16 %v1215_v58, %v1214_v56  ;;  %v2717_v56 = vld [vmem:[%s4005_s14] ss:$0 sm:$0xff] }
 0x517   :  { %v3178_v9 = vpop.eup %3177 }
 0x518   :  { %v371_v10 = vmul.f32 %v3178_v9, %v3176_v3  ;;  %v3180_v26 = vpop.eup %3179 }
 0x519   :  { %v709_v27 = vsel %vm360_vm3, %v3180_v26, 0.0  ;;  %3080 = vmatpush3.bf16.msra.mxu0 %v3077_v60  ;;  %v1216_v60 = vld [vmem:[%s4003_s12 + $0x30] sm:$0xff] }
 0x51a   :  { %2889 = vmatmul.mubr.msk.f32.vlgmr.msra.gmra.mrb[2].mxu1 %vm360_vm3, %v371_v10 }
 0x51b   :  { %2892 = vmatpush3.xpose.msk.msra.mxu1 %vm279_vm2, %v451_v44  ;;  %2893 = vmatprep.mubr.msk.f32.mxu1 %vm3387_vm1, %v3386_v37 }
 0x51c   :  { %2896 = vmatprep.subr.mxu1 %v3386_v37 }
 0x51e   :  { %2894 = vmatmul.mubr.msk.f32.vlgmr.msra.gmra.mrb[4].mxu1 %vm279_vm2, %v449_v5 }
 0x51f   :  { %2898 = vmatprep.mubr.msk.f32.mxu1 %vm3387_vm1, %v3386_v37 }
 0x5e7   :  { %v864_v13 = vpop.f32.mrb[4].mxu0 }
 0x5e8   :  { %v868_v14 = vmul.f32 0.25, %v864_v13  ;;  %v2915_v15 = vpop.f32.mrb[5].mxu0 }
 0x5ea   :  { %v869_v17 = vadd.f32 %v868_v14, %v3642_v57 }
 0x5ec   :  { %v870_v18 = vsel %vm360_vm3, %v869_v17, -inf }
 0x5ed   :  { %v3666_v19 = vpop.f32.mrb[2].mxu1  ;;  %871 = vmax.xlane.f32.xlu0 %v870_v18 }
 0x5ee   :  { %v2890_v20 = vpop.f32.mrb[3].mxu1 }
 0x5f1   :  { %v522_v21 = vpop.f32.mrb[4].mxu1 }
 0x5f2   :  { %v526_v22 = vmul.f32 0.25, %v522_v21  ;;  %v2895_v23 = vpop.f32.mrb[5].mxu1 }
 0x5f4   :  { %v527_v24 = vadd.f32 %v526_v22, %v3638_v50 }
 0x5f6   :  { %v528_v25 = vsel %vm360_vm3, %v527_v24, -inf }
 0x5f7   :  { %529 = vmax.xlane.f32.xlu1 %v528_v25  ;;  %v1101_v25 = vld [vmem:[%s4001_s10 + $0x8] sm:$0xff] }
 0x5fb   :  { %710 = vadd.xlane.f32.xlu1 %v709_v27  ;;  %v1102_v27 = vld [vmem:[%s4001_s10 + $0x10] sm:$0xff] }
 0x60c   :  { %539 = vrot.lane.b32.xlu1 %v3611_v41, %s3392_s19 }
 0x610   :  { %881 = vrot.lane.b32.xlu1 %v3617_v42, %s3392_s19 }
 0x67a   :  { %v872_v28 = vpop.xlane.xlu0 %871 }
 0x67b   :  { %v873_v29 = vsub.f32 %v869_v17, %v872_v28  ;;  %v1103_v28 = vld [vmem:[%s4001_s10 + $0x18] sm:$0xff] }
 0x67d   :  { %v874_v30 = vmul.f32 1.442695, %v873_v29  ;;  %v3085_v29 = vpack.c.bf16 %v1103_v28, %v1102_v27 }
 0x67f   :  { %3181 = vpow2.f32 %v874_v30 }
 0x684   :  { %v530_v31 = vpop.xlane.xlu1 %529 }
 0x685   :  { %v531_v32 = vsub.f32 %v527_v24, %v530_v31 }
 0x687   :  { %v532_v33 = vmul.f32 1.442695, %v531_v32 }
 0x688   :  { %v711_v35 = vpop.xlane.xlu1 %710 }
 0x689   :  { %v3182_v38 = vpop.eup %3181  ;;  %3183 = vpow2.f32 %v532_v33 }
 0x68a   :  { %v876_v39 = vsel %vm360_vm3, %v3182_v38, 0.0 }
 0x68b   :  { %877 = vadd.xlane.f32.xlu0 %v876_v39 }
 0x68c   :  { %v540_v40 = vpop.permute.xlu1 %539 }
 0x68d   :  { %2897 = vmatpush3.msra.mxu1 %v540_v40  ;;  %v2709_v40 = vld [vmem:[%s3999_s8] ss:$0 sm:$0xff] }
 0x68e   :  { %2906 = vmatprep.subr.mxu1 %v3386_v37 }
 0x693   :  { %v3184_v41 = vpop.eup %3183 }
 0x694   :  { %v534_v43 = vsel %vm360_vm3, %v3184_v41, 0.0 }
 0x695   :  { %535 = vadd.xlane.f32.xlu0 %v534_v43  ;;  %v2710_v43 = vld [vmem:[%s4000_s9] ss:$0 sm:$0xff] }
 0x6ab   :  { %714 = vrot.lane.b32.xlu0 %v3617_v42, %s3391_s26  ;;  %v882_v42 = vpop.permute.xlu1 %881 }
 0x718   :  { %v878_v44 = vpop.xlane.xlu0 %877 }
 0x722   :  { %v536_v45 = vpop.xlane.xlu0 %535 }
 0x723   :  { %3185 = vrcp.f32 %v536_v45 }
 0x724   :  { %3187 = vrcp.f32 %v711_v35 }
 0x725   :  { %3189 = vrcp.f32 %v878_v44 }
 0x726   :  { %v715_v49 = vpop.permute.xlu0 %714 }
 0x72d   :  { %v3186_v46 = vpop.eup %3185 }
 0x72e   :  { %v538_v47 = vmul.f32 %v3186_v46, %v3184_v41  ;;  %v3188_v48 = vpop.eup %3187 }
 0x72f   :  { %v713_v51 = vmul.f32 %v3188_v48, %v3180_v26  ;;  %v3190_v52 = vpop.eup %3189 }
 0x730   :  { %2899 = vmatmul.mubr.msk.f32.vlgmr.msra.gmra.mrb[6].mxu1 %vm360_vm3, %v538_v47  ;;  %v880_v53 = vmul.f32 %v3190_v52, %v3182_v38  ;;  %v1211_v52 = vld [vmem:[%s4003_s12 + $0x8] sm:$0xff] }
 0x731   :  { %2907 = vmatpush3.msra.mxu1 %v715_v49  ;;  %2908 = vmatprep.mubr.msk.f32.mxu1 %vm3387_vm1, %v3386_v37 }
 0x732   :  { %2916 = vmatprep.subr.mxu1 %v3386_v37 }
 0x734   :  { %2909 = vmatmul.mubr.msk.f32.vlgmr.msra.gmra.mrb[8].mxu1 %vm360_vm3, %v713_v51  ;;  %v1210_v51 = vld [vmem:[%s4003_s12] sm:$0xff] }
 0x735   :  { %2917 = vmatpush3.msra.mxu1 %v882_v42  ;;  %2918 = vmatprep.mubr.msk.f32.mxu1 %vm3387_vm1, %v3386_v37  ;;  %v3089_v42 = vpack.c.bf16 %v1211_v52, %v1210_v51 }
 0x737   :  { %3090 = vmatprep.subr.bf16.mxu0 %v3089_v42 }
 0x738   :  { %2919 = vmatmul.mubr.msk.f32.vlgmr.msra.gmra.mrb[10].mxu1 %vm360_vm3, %v880_v53  ;;  %v1212_v53 = vld [vmem:[%s4003_s12 + $0x10] sm:$0xff] }
 0x739   :  { %v3093_v55 = vpack.c.bf16 %v1213_v54, %v1212_v53 }
 0x803   :  { %v611_v61 = vpop.f32.mrb[6].mxu1 }
 0x804   :  { %616 = vrot.lane.b32.xlu1 %v611_v61, %s4035_s22  ;;  %v2900_v62 = vpop.f32.mrb[7].mxu1  ;;  %v1217_v61 = vld [vmem:[%s4003_s12 + $0x38] sm:$0xff] }
 0x805   :  { %v3101_v62 = vpack.c.bf16 %v1217_v61, %v1216_v60  ;;  %v2718_v61 = vld [vmem:[%s4006_s15] ss:$0 sm:$0xff] }
 0x807   :  { %v786_v63 = vpop.f32.mrb[8].mxu1 }
 0x808   :  { %v2910_v0 = vpop.f32.mrb[9].mxu1 }
 0x80b   :  { %v953_v1 = vpop.f32.mrb[10].mxu1 }
 0x80c   :  { %958 = vrot.lane.b32.xlu1 %v953_v1, %s4035_s22  ;;  %v2920_v2 = vpop.f32.mrb[11].mxu1 }
 0x876   :  { %v617_v3 = vpop.permute.xlu1 %616 }
 0x877   :  { %v619_v4 = vsel %vm279_vm2, %v3666_v19, %v617_v3 }
 0x878   :  { %2929 = vmatprep.mubr.msk.f32.mxu0 %vm139_vm0, %v619_v4 }
 0x87e   :  { %v959_v5 = vpop.permute.xlu1 %958 }
 0x87f   :  { %v961_v6 = vsel %vm279_vm2, %v786_v63, %v959_v5  ;;  %v2711_v63 = vld [vmem:[%s4002_s11] ss:$0 sm:$0xff] }
 0x880   :  { %2930 = vmatmul.mubr.msk.f32.vlgmr.msra.gmra.mrb[6].mxu0 %vm139_vm0, %v961_v6 }
 0x881   :  { %3092 = vmatpush3.bf16.msra.mxu0 %v3089_v42 }
 0x882   :  { %3094 = vmatprep.subr.bf16.mxu0 %v3093_v55 }
 0x885   :  { %3096 = vmatpush3.bf16.msra.mxu0 %v3093_v55 }
 0x886   :  { %3098 = vmatprep.subr.bf16.mxu0 %v3097_v59 }
 0x889   :  { %3100 = vmatpush3.bf16.msra.mxu0 %v3097_v59 }
 0x88a   :  { %3102 = vmatprep.subr.bf16.mxu0 %v3101_v62 }
 0x88d   :  { %3104 = vmatpush3.bf16.msra.mxu0 %v3101_v62 }
 0x88e   :  { %2983 = vmatprep.subr.mxu0 %v3386_v37 }
 0x953   :  { %v2931_v8 = vpop.f32.mrb[6].mxu0 }
 0x954   :  { %v1051_v9 = vadd.f32 %v2931_v8, %v2706_v7  ;;  %v1045_v10 = vpop.f32.mrb[7].mxu0 }
 0x955   :  { %v1046_v11 = vadd.f32 %v2706_v7, %v1045_v10 }
 0x956   :  { %v1055_v12 = vadd.f32 %v1051_v9, %v3601_v36 }
 0x957   :  { %v1054_v13 = vadd.f32 %v1046_v11, %v3597_v34  ;;  %v1100_v34 = vld [vmem:[%s4001_s10] sm:$0xff] }
 0x958   :  { %v1061_v14 = vsel %vm139_vm0, %v1055_v12, 0.0  ;;  %v3081_v26 = vpack.c.bf16 %v1101_v25, %v1100_v34 }
 0x959   :  { %1062 = vadd.xlane.f32.xlu1 %v1061_v14  ;;  %v1058_v15 = vsel %vm139_vm0, %v1054_v13, 0.0 }
 0x95a   :  { %1059 = vadd.xlane.f32.xlu0 %v1058_v15  ;;  %3082 = vmatprep.subr.bf16.mxu1 %v3081_v26 }
 0x95b   :  { %3084 = vmatpush3.bf16.msra.mxu1 %v3081_v26 }
 0x95c   :  { %3086 = vmatprep.subr.bf16.mxu1 %v3085_v29 }
 0x95f   :  { %3088 = vmatpush3.bf16.msra.mxu1 %v3085_v29 }
 0x9e6   :  { %v1063_v16 = vpop.xlane.xlu1 %1062 }
 0x9e7   :  { %v1065_v17 = vmul.f32 0.03125, %v1063_v16  ;;  %v1060_v18 = vpop.xlane.xlu0 %1059 }
 0x9e8   :  { %v1064_v19 = vmul.f32 0.03125, %v1060_v18 }
 0x9e9   :  { %v1067_v20 = vsub.f32 %v1055_v12, %v1065_v17 }
 0x9ea   :  { %v1066_v21 = vsub.f32 %v1054_v13, %v1064_v19 }
 0x9eb   :  { %v1069_v24 = vmul.f32 %v1067_v20, %v1067_v20 }
 0x9ec   :  { %v1068_v22 = vmul.f32 %v1066_v21, %v1066_v21 }
 0x9ed   :  { %v1073_v36 = vsel %vm139_vm0, %v1069_v24, 0.0 }
 0x9ee   :  { %v1070_v23 = vsel %vm139_vm0, %v1068_v22, 0.0  ;;  %v2714_v22 = vld [vmem:[%s4004_s13] ss:$0 sm:$0xff] }
 0x9ef   :  { %1071 = vadd.xlane.f32.xlu0 %v1070_v23 }
 0x9f3   :  { %1074 = vadd.xlane.f32.xlu0 %v1073_v36 }
 0xa7c   :  { %v1072_v30 = vpop.xlane.xlu0 %1071 }
 0xa7d   :  { %v1076_v31 = vmul.f32 0.03125, %v1072_v30 }
 0xa7f   :  { %v1078_v32 = vadd.f32 1e-12, %v1076_v31 }
 0xa80   :  { %v1075_v33 = vpop.xlane.xlu0 %1074 }
 0xa81   :  { %3191 = vrsqrt.f32 %v1078_v32  ;;  %v1077_v35 = vmul.f32 0.03125, %v1075_v33 }
 0xa83   :  { %v1079_v38 = vadd.f32 1e-12, %v1077_v35 }
 0xa85   :  { %3193 = vrsqrt.f32 %v1079_v38 }
 0xa8b   :  { %v3192_v39 = vpop.eup %3191 }
 0xa8c   :  { %v1082_v41 = vmul.f32 %v3192_v39, %v1066_v21 }
 0xa8e   :  { %v1090_v44 = vmul.f32 %v2709_v40, %v1082_v41 }
 0xa8f   :  { %v3194_v45 = vpop.eup %3193 }
 0xa90   :  { %v1083_v46 = vmul.f32 %v3194_v45, %v1067_v20  ;;  %v1098_v47 = vadd.f32 %v2710_v43, %v1090_v44  ;;  %v2720_v44 = vld [vmem:[%s4036_s21 + $0x28] sm:$0xff] }
 0xa92   :  { %v1091_v48 = vmul.f32 %v2709_v40, %v1083_v46  ;;  %2940 = vmatprep.mubr.msk.f32.mxu1 %vm139_vm0, %v1098_v47  ;;  %v2721_v46 = vld [vmem:[%s4036_s21 + $0x30] sm:$0xff] }
 0xa94   :  { %v1099_v49 = vadd.f32 %v2710_v43, %v1091_v48  ;;  %v2719_v43 = vld [vmem:[%s4036_s21 + $0x20] sm:$0xff] }
 0xa95   :  { %v3105_v45 = vpack.c.bf16 %v2720_v44, %v2719_v43 }
 0xa96   :  { %2941 = vmatmul.mubr.msk.f32.vlgmr.msra.gmra.mrb[12].mxu1 %vm139_vm0, %v1099_v49 }
 0xa97   :  { %3106 = vmatprep.subr.bf16.mxu1 %v3105_v45 }
 0xa98   :  { %3108 = vmatpush3.bf16.msra.mxu1 %v3105_v45 }
 0xb69   :  { %v2942_v0 = vpop.f32.mrb[12].mxu1 }
 0xb6a   :  { %v1189_v1 = vadd.f32 %v2942_v0, %v2711_v63  ;;  %v1183_v2 = vpop.f32.mrb[13].mxu1 }
 0xb6b   :  { %v1184_v3 = vadd.f32 %v2711_v63, %v1183_v2  ;;  %v2723_v2 = vld [vmem:[#allocation9 + $0x1] ss:$0 sm:$0xff] }
 0xb6c   :  { %v1195_v4 = vmul.f32 0.044715, %v1189_v1  ;;  %v1193_v19 = vmul.f32 0.5, %v1189_v1 }
 0xb6d   :  { %v1194_v5 = vmul.f32 0.044715, %v1184_v3  ;;  %v1192_v17 = vmul.f32 0.5, %v1184_v3 }
 0xb6e   :  { %v1197_v6 = vmul.f32 %v1195_v4, %v1189_v1 }
 0xb6f   :  { %v1196_v7 = vmul.f32 %v1194_v5, %v1184_v3 }
 0xb70   :  { %v1199_v8 = vmul.f32 %v1197_v6, %v1189_v1 }
 0xb71   :  { %v1198_v9 = vmul.f32 %v1196_v7, %v1184_v3 }
 0xb72   :  { %v1201_v10 = vadd.f32 %v1199_v8, %v1189_v1 }
 0xb73   :  { %v1200_v11 = vadd.f32 %v1198_v9, %v1184_v3 }
 0xb74   :  { %v1203_v12 = vmul.f32 0.7978846, %v1201_v10 }
 0xb75   :  { %v1202_v13 = vmul.f32 0.7978846, %v1200_v11 }
 0xb76   :  { %3195 = vtanh.f32 %v1203_v12 }
 0xb77   :  { %3197 = vtanh.f32 %v1202_v13 }
 0xb80   :  { %v3196_v14 = vpop.eup %3195 }
 0xb81   :  { %v3198_v15 = vpop.eup %3197  ;;  %v1207_v16 = vadd.f32 1.0, %v3196_v14 }
 0xb82   :  { %v1206_v18 = vadd.f32 1.0, %v3198_v15 }
 0xb83   :  { %v1209_v21 = vmul.f32 %v1207_v16, %v1193_v19 }
 0xb84   :  { %v1208_v20 = vmul.f32 %v1206_v18, %v1192_v17 }
 0xb86   :  { %2959 = vmatprep.mubr.msk.f32.mxu0 %vm1225_vm4, %v1208_v20 }
 0xb87   :  { %2960 = vmatmul.mubr.msk.f32.vlgmr.msra.gmra.mrb[8].mxu0 %vm1225_vm4, %v1209_v21 }
 0xb88   :  { %2985 = vmatprep.mubr.msk.f32.mxu0 %vm3387_vm1, %v3386_v37 }
 0xc5a   :  { %v2961_v23 = vpop.f32.mrb[8].mxu0 }
 0xc5b   :  { %v1304_v24 = vadd.f32 %v2961_v23, %v2714_v22  ;;  %v1298_v36 = vpop.f32.mrb[9].mxu0 }
 0xc5c   :  { %v1299_v34 = vadd.f32 %v2714_v22, %v1298_v36 }
 0xc5d   :  { %v1308_v25 = vadd.f32 %v1304_v24, %v1099_v49 }
 0xc5e   :  { %v1307_v26 = vadd.f32 %v1299_v34, %v1098_v47  ;;  %v2722_v47 = vld [vmem:[%s4036_s21 + $0x38] sm:$0xff] }
 0xc5f   :  { %v1314_v27 = vsel %vm139_vm0, %v1308_v25, 0.0  ;;  %v3109_v48 = vpack.c.bf16 %v2722_v47, %v2721_v46 }
 0xc60   :  { %1315 = vadd.xlane.f32.xlu1 %v1314_v27  ;;  %v1311_v28 = vsel %vm139_vm0, %v1307_v26, 0.0 }
 0xc61   :  { %1312 = vadd.xlane.f32.xlu0 %v1311_v28  ;;  %3110 = vmatprep.subr.bf16.mxu1 %v3109_v48 }
 0xc62   :  { %3112 = vmatpush3.bf16.msra.mxu1 %v3109_v48 }
 0xc63   :  { %2973 = vmatprep.subr.mxu1 %v3386_v37 }
 0xced   :  { %v1316_v29 = vpop.xlane.xlu1 %1315 }
 0xcee   :  { %v1318_v30 = vmul.f32 0.03125, %v1316_v29  ;;  %v1313_v31 = vpop.xlane.xlu0 %1312 }
 0xcef   :  { %v1317_v32 = vmul.f32 0.03125, %v1313_v31 }
 0xcf0   :  { %v1320_v33 = vsub.f32 %v1308_v25, %v1318_v30 }
 0xcf1   :  { %v1319_v35 = vsub.f32 %v1307_v26, %v1317_v32 }
 0xcf2   :  { %v1322_v38 = vmul.f32 %v1320_v33, %v1320_v33 }
 0xcf3   :  { %v1321_v39 = vmul.f32 %v1319_v35, %v1319_v35 }
 0xcf4   :  { %v1326_v40 = vsel %vm139_vm0, %v1322_v38, 0.0 }
 0xcf5   :  { %1327 = vadd.xlane.f32.xlu1 %v1326_v40  ;;  %v1323_v41 = vsel %vm139_vm0, %v1321_v39, 0.0 }
 0xcf6   :  { %1324 = vadd.xlane.f32.xlu0 %v1323_v41 }
 0xd82   :  { %v1328_v49 = vpop.xlane.xlu1 %1327 }
 0xd83   :  { %v1330_v51 = vmul.f32 0.03125, %v1328_v49  ;;  %v1325_v52 = vpop.xlane.xlu0 %1324 }
 0xd84   :  { %v1329_v42 = vmul.f32 0.03125, %v1325_v52 }
 0xd85   :  { %v1332_v53 = vadd.f32 1e-12, %v1330_v51 }
 0xd86   :  { %v1331_v54 = vadd.f32 1e-12, %v1329_v42 }
 0xd87   :  { %3199 = vrsqrt.f32 %v1332_v53 }
 0xd88   :  { %3201 = vrsqrt.f32 %v1331_v54 }
 0xd91   :  { %v3200_v55 = vpop.eup %3199 }
 0xd92   :  { %v3202_v58 = vpop.eup %3201  ;;  %v1336_v59 = vmul.f32 %v3200_v55, %v1320_v33 }
 0xd93   :  { %v1335_v60 = vmul.f32 %v3202_v58, %v1319_v35 }
 0xd94   :  { %v1344_v62 = vmul.f32 %v2717_v56, %v1336_v59 }
 0xd95   :  { %v1343_v63 = vmul.f32 %v2717_v56, %v1335_v60 }
 0xd96   :  { %v3793_v1 = vadd.f32 %v2718_v61, %v1344_v62 }
 0xd97   :  { %v3791_v0 = vadd.f32 %v2718_v61, %v1343_v63 }
 0xd99   :  { %2970 = vmatprep.mubr.msk.f32.mxu1 %vm139_vm0, %v3791_v0 }
 0xd9a   :  { %2971 = vmatmul.mubr.msk.f32.vlgmr.msra.gmra.mrb[14].mxu1 %vm139_vm0, %v3793_v1 }
 0xd9b   :  { %2975 = vmatprep.mubr.msk.f32.mxu1 %vm3387_vm1, %v3386_v37 }
 0xe6d   :  { %v2972_v3 = vpop.f32.mrb[14].mxu1 }
 0xe6e   :  { %v1438_v4 = vpop.f32.mrb[15].mxu1  ;;  %v3807_v6 = vadd.f32 %v2972_v3, %v2723_v2 }
 0xe6f   :  { %v3801_v5 = vadd.f32 %v2723_v2, %v1438_v4 }
 0xe71   :  { %1615 = vrot.lane.b32.xlu1 %v3801_v5, %s3389_s4  ;;  %1448 = vrot.lane.b32.xlu0 %v3801_v5, %s3388_s20 }
 0xe75   :  { %1613 = vrot.lane.b32.xlu1 %v3801_v5, %s3390_s24  ;;  %1953 = vrot.lane.b32.xlu0 %v3807_v6, %s3389_s4 }
 0xe79   :  { %1786 = vrot.lane.b32.xlu1 %v3807_v6, %s3388_s20 }
 0xe7d   :  { %1951 = vrot.lane.b32.xlu1 %v3807_v6, %s3390_s24 }
 0xee3   :  { %v1616_v7 = vpop.permute.xlu1 %1615  ;;  %v1449_v8 = vpop.permute.xlu0 %1448 }
 0xee4   :  { %2974 = vmatpush3.xpose.msk.msra.mxu1 %vm279_vm2, %v1449_v8  ;;  %2984 = vmatpush3.xpose.msk.msra.mxu0 %vm279_vm2, %v1616_v7  ;;  %v2738_v8 = vld [vmem:[%s3997_s6 + $0x20] sm:$0xff] }
 0xee5   :  { %2993 = vmatprep.subr.mxu0 %v3386_v37  ;;  %2978 = vmatprep.subr.mxu1 %v3386_v37 }
 0xee7   :  { %v1614_v9 = vpop.permute.xlu1 %1613  ;;  %2976 = vmatmul.mubr.msk.f32.vlgmr.msra.gmra.mrb[16].mxu1 %vm279_vm2, %v3801_v5  ;;  %v1954_v11 = vpop.permute.xlu0 %1953 }
 0xee8   :  { %2986 = vmatmul.mubr.msk.f32.vlgmr.msra.gmra.mrb[10].mxu0 %vm279_vm2, %v1614_v9  ;;  %2980 = vmatprep.mubr.msk.f32.mxu1 %vm3387_vm1, %v3386_v37  ;;  %v2739_v9 = vld [vmem:[%s3997_s6 + $0x28] sm:$0xff] }
 0xee9   :  { %2995 = vmatprep.mubr.msk.f32.mxu0 %vm3387_vm1, %v3386_v37 }
 0xeeb   :  { %v1787_v10 = vpop.permute.xlu1 %1786 }
 0xeec   :  { %2994 = vmatpush3.xpose.msk.msra.mxu0 %vm279_vm2, %v1787_v10  ;;  %v2740_v10 = vld [vmem:[%s3997_s6 + $0x30] sm:$0xff] }
 0xeed   :  { %3003 = vmatprep.subr.mxu0 %v3386_v37 }
 0xeef   :  { %2996 = vmatmul.mubr.msk.f32.vlgmr.msra.gmra.mrb[12].mxu0 %vm279_vm2, %v3807_v6  ;;  %v1952_v12 = vpop.permute.xlu1 %1951 }
 0xef0   :  { %3004 = vmatpush3.xpose.msk.msra.mxu0 %vm279_vm2, %v1954_v11  ;;  %3005 = vmatprep.mubr.msk.f32.mxu0 %vm3387_vm1, %v3386_v37  ;;  %v3113_v11 = vpack.c.bf16 %v2739_v9, %v2738_v8  ;;  %v2760_v8 = vld [vmem:[%s4003_s12 + $0x58] sm:$0xff] }
 0xef2   :  { %3114 = vmatprep.subr.bf16.mxu0 %v3113_v11 }
 0xef3   :  { %3006 = vmatmul.mubr.msk.f32.vlgmr.msra.gmra.mrb[14].mxu0 %vm279_vm2, %v1952_v12  ;;  %v2741_v12 = vld [vmem:[%s3997_s6 + $0x38] sm:$0xff] }
 0xef4   :  { %3116 = vmatpush3.bf16.msra.mxu0 %v3113_v11 }
 0xfba   :  { %v1520_v13 = vpop.f32.mrb[16].mxu1 }
 0xfbb   :  { %v1524_v14 = vmul.f32 0.25, %v1520_v13  ;;  %v2977_v15 = vpop.f32.mrb[17].mxu1  ;;  %v1687_v16 = vpop.f32.mrb[10].mxu0  ;;  %v3117_v13 = vpack.c.bf16 %v2741_v12, %v2740_v10  ;;  %v2762_v10 = vld [vmem:[%s4003_s12 + $0x68] sm:$0xff]  ;;  %v2763_v12 = vld [vmem:[%s4003_s12 + $0x70] sm:$0xff] }
 0xfbc   :  { %v1691_v17 = vmul.f32 0.25, %v1687_v16  ;;  %v2987_v18 = vpop.f32.mrb[11].mxu0 }
 0xfbd   :  { %v1525_v19 = vadd.f32 %v1524_v14, %v3638_v50  ;;  %3118 = vmatprep.subr.bf16.mxu0 %v3117_v13 }
 0xfbe   :  { %v1692_v20 = vadd.f32 %v1691_v17, %v3638_v50  ;;  %3120 = vmatpush3.bf16.msra.mxu0 %v3117_v13  ;;  %v2764_v13 = vld [vmem:[%s4003_s12 + $0x78] sm:$0xff] }
 0xfbf   :  { %v1526_v21 = vsel %vm360_vm3, %v1525_v19, -inf }
 0xfc0   :  { %1527 = vmax.xlane.f32.xlu0 %v1526_v21  ;;  %v1693_v22 = vsel %vm360_vm3, %v1692_v20, -inf }
 0xfc1   :  { %1694 = vmax.xlane.f32.xlu1 %v1693_v22 }
 0xfc2   :  { %v1858_v23 = vpop.f32.mrb[12].mxu0 }
 0xfc3   :  { %v1862_v24 = vmul.f32 0.25, %v1858_v23  ;;  %v2997_v36 = vpop.f32.mrb[13].mxu0 }
 0xfc5   :  { %v1863_v34 = vadd.f32 %v1862_v24, %v3642_v57 }
 0xfc6   :  { %v2025_v25 = vpop.f32.mrb[14].mxu0 }
 0xfc7   :  { %v2029_v26 = vmul.f32 0.25, %v2025_v25  ;;  %v3007_v27 = vpop.f32.mrb[15].mxu0  ;;  %v1864_v28 = vsel %vm360_vm3, %v1863_v34, -inf }
 0xfc8   :  { %1865 = vmax.xlane.f32.xlu0 %v1864_v28 }
 0xfc9   :  { %v2030_v29 = vadd.f32 %v2029_v26, %v3642_v57 }
 0xfcb   :  { %v2031_v50 = vsel %vm360_vm3, %v2030_v29, -inf }
 0xfcc   :  { %2032 = vmax.xlane.f32.xlu0 %v2031_v50 }
0x104d   :  { %v1528_v30 = vpop.xlane.xlu0 %1527 }
0x104e   :  { %v1529_v31 = vsub.f32 %v1525_v19, %v1528_v30  ;;  %v1695_v32 = vpop.xlane.xlu1 %1694 }
0x104f   :  { %v1696_v33 = vsub.f32 %v1692_v20, %v1695_v32 }
0x1050   :  { %v1530_v35 = vmul.f32 1.442695, %v1529_v31 }
0x1051   :  { %v1697_v38 = vmul.f32 1.442695, %v1696_v33 }
0x1052   :  { %3203 = vpow2.f32 %v1530_v35 }
0x1053   :  { %3205 = vpow2.f32 %v1697_v38 }
0x1055   :  { %v1866_v39 = vpop.xlane.xlu0 %1865 }
0x1056   :  { %v1867_v40 = vsub.f32 %v1863_v34, %v1866_v39  ;;  %v2742_v34 = vld [vmem:[#allocation11 + $0x1] ss:$0 sm:$0xff] }
0x1058   :  { %v1868_v41 = vmul.f32 1.442695, %v1867_v40 }
0x1059   :  { %v2033_v48 = vpop.xlane.xlu0 %2032 }
0x105a   :  { %3207 = vpow2.f32 %v1868_v41  ;;  %v2034_v49 = vsub.f32 %v2030_v29, %v2033_v48 }
0x105c   :  { %v3204_v43 = vpop.eup %3203  ;;  %v2035_v51 = vmul.f32 1.442695, %v2034_v49 }
0x105d   :  { %v3206_v44 = vpop.eup %3205  ;;  %v1532_v45 = vsel %vm360_vm3, %v3204_v43, 0.0 }
0x105e   :  { %1533 = vadd.xlane.f32.xlu0 %v1532_v45  ;;  %v1699_v57 = vsel %vm360_vm3, %v3206_v44, 0.0  ;;  %3209 = vpow2.f32 %v2035_v51  ;;  %v2750_v45 = vld [vmem:[%s4001_s10 + $0x28] sm:$0xff] }
0x105f   :  { %1700 = vadd.xlane.f32.xlu1 %v1699_v57 }
0x1064   :  { %v3208_v46 = vpop.eup %3207 }
0x1065   :  { %v1870_v47 = vsel %vm360_vm3, %v3208_v46, 0.0 }
0x1066   :  { %1871 = vadd.xlane.f32.xlu0 %v1870_v47  ;;  %v2752_v47 = vld [vmem:[%s4001_s10 + $0x38] sm:$0xff] }
0x1068   :  { %v3210_v52 = vpop.eup %3209 }
0x1069   :  { %v2037_v42 = vsel %vm360_vm3, %v3210_v52, 0.0 }
0x1070   :  { %1704 = vrot.lane.b32.xlu1 %v3801_v5, %s3392_s19 }
0x1074   :  { %1875 = vrot.lane.b32.xlu1 %v3807_v6, %s3391_s26 }
0x107c   :  { %1537 = vrot.lane.b32.xlu0 %v3801_v5, %s3391_s26 }
0x1098   :  { %2038 = vadd.xlane.f32.xlu1 %v2037_v42 }
0x10a9   :  { %2042 = vrot.lane.b32.xlu1 %v3807_v6, %s3392_s19 }
0x10eb   :  { %v1534_v53 = vpop.xlane.xlu0 %1533 }
0x10ec   :  { %3211 = vrcp.f32 %v1534_v53  ;;  %v1701_v54 = vpop.xlane.xlu1 %1700 }
0x10ed   :  { %3213 = vrcp.f32 %v1701_v54 }
0x10f0   :  { %v1705_v59 = vpop.permute.xlu1 %1704 }
0x10f3   :  { %v1872_v55 = vpop.xlane.xlu0 %1871 }
0x10f4   :  { %3215 = vrcp.f32 %v1872_v55  ;;  %v1876_v63 = vpop.permute.xlu1 %1875 }
0x10f6   :  { %v3212_v56 = vpop.eup %3211 }
0x10f7   :  { %v1536_v58 = vmul.f32 %v3212_v56, %v3204_v43  ;;  %v1538_v60 = vpop.permute.xlu0 %1537  ;;  %v3214_v61 = vpop.eup %3213  ;;  %v2747_v56 = vld [vmem:[%s3999_s8 + $0x1] ss:$0 sm:$0xff] }
0x10f8   :  { %2979 = vmatpush3.msra.mxu1 %v1538_v60  ;;  %v1703_v62 = vmul.f32 %v3214_v61, %v3206_v44 }
0x10f9   :  { %2981 = vmatmul.mubr.msk.f32.vlgmr.msra.gmra.mrb[18].mxu1 %vm360_vm3, %v1536_v58  ;;  %2988 = vmatprep.subr.mxu1 %v3386_v37 }
0x10fa   :  { %2989 = vmatpush3.msra.mxu1 %v1705_v59  ;;  %2990 = vmatprep.mubr.msk.f32.mxu1 %vm3387_vm1, %v3386_v37  ;;  %v2748_v59 = vld [vmem:[%s4000_s9 + $0x1] ss:$0 sm:$0xff] }
0x10fb   :  { %2998 = vmatprep.subr.mxu1 %v3386_v37 }
0x10fd   :  { %2991 = vmatmul.mubr.msk.f32.vlgmr.msra.gmra.mrb[20].mxu1 %vm360_vm3, %v1703_v62 }
0x10fe   :  { %v3216_v2 = vpop.eup %3215  ;;  %2999 = vmatpush3.msra.mxu1 %v1876_v63  ;;  %3000 = vmatprep.mubr.msk.f32.mxu1 %vm3387_vm1, %v3386_v37 }
0x10ff   :  { %v1874_v3 = vmul.f32 %v3216_v2, %v3208_v46  ;;  %3008 = vmatprep.subr.mxu1 %v3386_v37  ;;  %v2751_v46 = vld [vmem:[%s4001_s10 + $0x30] sm:$0xff] }
0x1100   :  { %v3125_v48 = vpack.c.bf16 %v2752_v47, %v2751_v46 }
0x1101   :  { %3001 = vmatmul.mubr.msk.f32.vlgmr.msra.gmra.mrb[22].mxu1 %vm360_vm3, %v1874_v3 }
0x1102   :  { %3010 = vmatprep.mubr.msk.f32.mxu1 %vm3387_vm1, %v3386_v37 }
0x1125   :  { %v2039_v4 = vpop.xlane.xlu1 %2038 }
0x1126   :  { %3217 = vrcp.f32 %v2039_v4  ;;  %v2757_v4 = vld [vmem:[%s4003_s12 + $0x40] sm:$0xff] }
0x1129   :  { %v2043_v5 = vpop.permute.xlu1 %2042 }
0x112a   :  { %3009 = vmatpush3.msra.mxu1 %v2043_v5  ;;  %v2758_v5 = vld [vmem:[%s4003_s12 + $0x48] sm:$0xff] }
0x1130   :  { %v3218_v6 = vpop.eup %3217 }
0x1131   :  { %v2041_v7 = vmul.f32 %v3218_v6, %v3210_v52  ;;  %v3129_v6 = vpack.c.bf16 %v2758_v5, %v2757_v4 }
0x1133   :  { %3011 = vmatmul.mubr.msk.f32.vlgmr.msra.gmra.mrb[24].mxu1 %vm360_vm3, %v2041_v7  ;;  %v2759_v7 = vld [vmem:[%s4003_s12 + $0x50] sm:$0xff]  ;;  %3130 = vmatprep.subr.bf16.mxu0 %v3129_v6 }
0x1134   :  { %v3133_v9 = vpack.c.bf16 %v2760_v8, %v2759_v7  ;;  %v2771_v8 = vld [vmem:[%s4005_s14 + $0x1] ss:$0 sm:$0xff] }
0x11cc   :  { %v1609_v14 = vpop.f32.mrb[18].mxu1 }
0x11cd   :  { %v2982_v15 = vpop.f32.mrb[19].mxu1 }
0x11ce   :  { %v2754_v15 = vld [vmem:[%s4002_s11 + $0x1] ss:$0 sm:$0xff] }
0x11d0   :  { %v1776_v16 = vpop.f32.mrb[20].mxu1 }
0x11d1   :  { %1781 = vrot.lane.b32.xlu0 %v1776_v16, %s4035_s22  ;;  %v2992_v17 = vpop.f32.mrb[21].mxu1 }
0x11d4   :  { %v1947_v18 = vpop.f32.mrb[22].mxu1 }
0x11d5   :  { %v3002_v19 = vpop.f32.mrb[23].mxu1 }
0x1206   :  { %v2114_v20 = vpop.f32.mrb[24].mxu1 }
0x1207   :  { %2119 = vrot.lane.b32.xlu1 %v2114_v20, %s4035_s22  ;;  %v3012_v21 = vpop.f32.mrb[25].mxu1  ;;  %s3347_s22 = scalar_lea.vmem %s2679_s0, 16 }
0x1208   :  { %p3348_p12 = scmp.ne.s32.totalorder %s2679_s0, %s3347_s22  ;;  %p3353_p0 = scmp.lt.s32.totalorder %s3351_s29, %s3347_s22 }
0x120a   :  { %p3354_p1 = por %p3353_p0, %p3352_p13 }
0x120c   :  { %p3355_p2 = pnand %p3354_p1, %p3348_p12 }
0x1243   :  { %v1782_v22 = vpop.permute.xlu0 %1781 }
0x1244   :  { %v1784_v23 = vsel %vm279_vm2, %v1609_v14, %v1782_v22  ;;  %v3141_v14 = vpack.c.bf16 %v2764_v13, %v2763_v12 }
0x1245   :  { %3021 = vmatprep.mubr.msk.f32.mxu0 %vm139_vm0, %v1784_v23 }
0x1279   :  { %v2120_v24 = vpop.permute.xlu1 %2119 }
0x127a   :  { %v2122_v36 = vsel %vm279_vm2, %v1947_v18, %v2120_v24 }
0x127b   :  { %3022 = vmatmul.mubr.msk.f32.vlgmr.msra.gmra.mrb[16].mxu0 %vm139_vm0, %v2122_v36 }
0x127c   :  { %3132 = vmatpush3.bf16.msra.mxu0 %v3129_v6 }
0x127d   :  { %3134 = vmatprep.subr.bf16.mxu0 %v3133_v9 }
0x1280   :  { %3136 = vmatpush3.bf16.msra.mxu0 %v3133_v9 }
0x134e   :  { %v3023_v25 = vpop.f32.mrb[16].mxu0 }
0x134f   :  { %v2214_v26 = vadd.f32 %v3023_v25, %v2742_v34  ;;  %v2208_v27 = vpop.f32.mrb[17].mxu0 }
0x1350   :  { %v2209_v28 = vadd.f32 %v2742_v34, %v2208_v27 }
0x1351   :  { %v2218_v29 = vadd.f32 %v2214_v26, %v3793_v1 }
0x1352   :  { %v2217_v50 = vadd.f32 %v2209_v28, %v3791_v0  ;;  %v2749_v0 = vld [vmem:[%s4001_s10 + $0x20] sm:$0xff] }
0x1353   :  { %v2226_v30 = vsel %vm139_vm0, %v2218_v29, 0.0  ;;  %v3121_v57 = vpack.c.bf16 %v2750_v45, %v2749_v0 }
0x1354   :  { %2227 = vadd.xlane.f32.xlu1 %v2226_v30  ;;  %v2223_v31 = vsel %vm139_vm0, %v2217_v50, 0.0 }
0x1355   :  { %2224 = vadd.xlane.f32.xlu0 %v2223_v31  ;;  %3122 = vmatprep.subr.bf16.mxu1 %v3121_v57 }
0x1356   :  { %3124 = vmatpush3.bf16.msra.mxu1 %v3121_v57 }
0x1357   :  { %3126 = vmatprep.subr.bf16.mxu1 %v3125_v48 }
0x135a   :  { %3128 = vmatpush3.bf16.msra.mxu1 %v3125_v48 }
0x13e1   :  { %v2228_v32 = vpop.xlane.xlu1 %2227 }
0x13e2   :  { %v2230_v33 = vmul.f32 0.03125, %v2228_v32  ;;  %v2225_v35 = vpop.xlane.xlu0 %2224 }
0x13e3   :  { %v2229_v38 = vmul.f32 0.03125, %v2225_v35 }
0x13e4   :  { %v2232_v39 = vsub.f32 %v2218_v29, %v2230_v33 }
0x13e5   :  { %v2231_v40 = vsub.f32 %v2217_v50, %v2229_v38  ;;  %v2766_v38 = vld [vmem:[%s4004_s13 + $0x1] ss:$0 sm:$0xff] }
0x13e6   :  { %v2234_v44 = vmul.f32 %v2232_v39, %v2232_v39 }
0x13e7   :  { %v2233_v41 = vmul.f32 %v2231_v40, %v2231_v40 }
0x13e8   :  { %v2238_v1 = vsel %vm139_vm0, %v2234_v44, 0.0 }
0x13e9   :  { %v2235_v43 = vsel %vm139_vm0, %v2233_v41, 0.0 }
0x13ea   :  { %2236 = vadd.xlane.f32.xlu0 %v2235_v43 }
0x13ee   :  { %2239 = vadd.xlane.f32.xlu0 %v2238_v1 }
0x1477   :  { %v2237_v49 = vpop.xlane.xlu0 %2236 }
0x1478   :  { %v2241_v51 = vmul.f32 0.03125, %v2237_v49 }
0x147a   :  { %v2243_v52 = vadd.f32 1e-12, %v2241_v51 }
0x147b   :  { %v2240_v42 = vpop.xlane.xlu0 %2239 }
0x147c   :  { %3219 = vrsqrt.f32 %v2243_v52  ;;  %v2242_v53 = vmul.f32 0.03125, %v2240_v42 }
0x147e   :  { %v2244_v54 = vadd.f32 1e-12, %v2242_v53 }
0x1480   :  { %3221 = vrsqrt.f32 %v2244_v54 }
0x1486   :  { %v3220_v55 = vpop.eup %3219 }
0x1487   :  { %v2247_v58 = vmul.f32 %v3220_v55, %v2231_v40  ;;  %v2528_v55 = vld [vmem:[%s4007_s16] sm:$0xff] }
0x1489   :  { %v2255_v60 = vmul.f32 %v2747_v56, %v2247_v58 }
0x148a   :  { %v3222_v61 = vpop.eup %3221 }
0x148b   :  { %v2248_v62 = vmul.f32 %v3222_v61, %v2232_v39  ;;  %v2263_v63 = vadd.f32 %v2748_v59, %v2255_v60  ;;  %v2531_v60 = vld [vmem:[%s4007_s16 + $0x18] sm:$0xff]  ;;  %v3393_v61 = vmov 0.0|0.0  }
0x148c   :  { %3145 = vmatprep.subr.bf16.mxu1 %v3393_v61 }
0x148d   :  { %v2256_v2 = vmul.f32 %v2747_v56, %v2248_v62  ;;  %3032 = vmatprep.mubr.msk.f32.mxu1 %vm139_vm0, %v2263_v63  ;;  %v2529_v56 = vld [vmem:[%s4007_s16 + $0x8] sm:$0xff] }
0x148e   :  { %v3146_v58 = vpack.c.bf16 %v2529_v56, %v2528_v55 }
0x148f   :  { %v2264_v3 = vadd.f32 %v2748_v59, %v2256_v2  ;;  %v2530_v59 = vld [vmem:[%s4007_s16 + $0x10] sm:$0xff] }
0x1490   :  { %v3149_v62 = vpack.c.bf16 %v2531_v60, %v2530_v59 }
0x1491   :  { %3033 = vmatmul.mubr.msk.f32.vlgmr.msra.gmra.mrb[26].mxu1 %vm139_vm0, %v2264_v3 }
0x1492   :  { %3062 = vmatprep.mubr.msk.f32.mxu1 %vm3387_vm1, %v3386_v37  ;;  %v2761_v37 = vld [vmem:[%s4003_s12 + $0x60] sm:$0xff]  ;;  %3147 = vmatpush3.bf16.msra.mxu1 %v3146_v58 }
0x1493   :  { %v3137_v11 = vpack.c.bf16 %v2762_v10, %v2761_v37  ;;  %3148 = vmatprep.subr.bf16.mxu1 %v3393_v61 }
0x1495   :  { %3138 = vmatprep.subr.bf16.mxu0 %v3137_v11 }
0x1496   :  { %3140 = vmatpush3.bf16.msra.mxu0 %v3137_v11  ;;  %3150 = vmatpush3.bf16.msra.mxu1 %v3149_v62  ;;  %v2772_v11 = vld [vmem:[%s4006_s15 + $0x1] ss:$0 sm:$0xff] }
0x1497   :  { %3142 = vmatprep.subr.bf16.mxu0 %v3141_v14 }
0x149a   :  { %3144 = vmatpush3.bf16.msra.mxu0 %v3141_v14 }
0x1564   :  { %v3034_v16 = vpop.f32.mrb[26].mxu1 }
0x1565   :  { %v2356_v17 = vadd.f32 %v3034_v16, %v2754_v15  ;;  %v2350_v18 = vpop.f32.mrb[27].mxu1 }
0x1566   :  { %v2351_v19 = vadd.f32 %v2754_v15, %v2350_v18  ;;  %v2773_v18 = vld [vmem:[%s4008_s17] ss:$0 sm:$0xff] }
0x1567   :  { %v2362_v20 = vmul.f32 0.044715, %v2356_v17  ;;  %v2360_v32 = vmul.f32 0.5, %v2356_v17 }
0x1568   :  { %v2361_v21 = vmul.f32 0.044715, %v2351_v19  ;;  %v2359_v30 = vmul.f32 0.5, %v2351_v19 }
0x1569   :  { %v2364_v22 = vmul.f32 %v2362_v20, %v2356_v17 }
0x156a   :  { %v2363_v23 = vmul.f32 %v2361_v21, %v2351_v19 }
0x156b   :  { %v2366_v24 = vmul.f32 %v2364_v22, %v2356_v17  ;;  %v2775_v22 = vld [vmem:[%s4009_s18] ss:$0 sm:$0xff]  ;;  %s4038_s18 = sld [smem:[#allocation23_spill]] }
0x156c   :  { %v2365_v36 = vmul.f32 %v2363_v23, %v2351_v19 }
0x156d   :  { %v2368_v34 = vadd.f32 %v2366_v24, %v2356_v17 }
0x156e   :  { %v2367_v25 = vadd.f32 %v2365_v36, %v2351_v19 }
0x156f   :  { %v2370_v26 = vmul.f32 0.7978846, %v2368_v34  ;;  %v2776_v34 = vld [vmem:[#allocation2] ss:$0 sm:$0xff] }
0x1570   :  { %v2369_v27 = vmul.f32 0.7978846, %v2367_v25 }
0x1571   :  { %3223 = vtanh.f32 %v2370_v26 }
0x1572   :  { %3225 = vtanh.f32 %v2369_v27 }
0x157b   :  { %v3224_v28 = vpop.eup %3223 }
0x157c   :  { %v3226_v29 = vpop.eup %3225  ;;  %v2374_v50 = vadd.f32 1.0, %v3224_v28 }
0x157d   :  { %v2373_v31 = vadd.f32 1.0, %v3226_v29 }
0x157e   :  { %v2376_v35 = vmul.f32 %v2374_v50, %v2360_v32 }
0x157f   :  { %v2375_v33 = vmul.f32 %v2373_v31, %v2359_v30 }
0x1581   :  { %3051 = vmatprep.mubr.msk.f32.mxu0 %vm1225_vm4, %v2375_v33 }
0x1582   :  { %3052 = vmatmul.mubr.msk.f32.vlgmr.msra.gmra.mrb[18].mxu0 %vm1225_vm4, %v2376_v35 }
0x1655   :  { %v3053_v39 = vpop.f32.mrb[18].mxu0 }
0x1656   :  { %v2472_v40 = vadd.f32 %v3053_v39, %v2766_v38  ;;  %v2466_v41 = vpop.f32.mrb[19].mxu0  ;;  %v2633_v39 = vld [vmem:[%s4038_s18] sm:$0x3] }
0x1657   :  { %v2467_v43 = vadd.f32 %v2766_v38, %v2466_v41 }
0x1658   :  { %v2476_v44 = vadd.f32 %v2472_v40, %v2264_v3 }
0x1659   :  { %v2475_v1 = vadd.f32 %v2467_v43, %v2263_v63 }
0x165a   :  { %v2484_v0 = vsel %vm139_vm0, %v2476_v44, 0.0 }
0x165b   :  { %2485 = vadd.xlane.f32.xlu0 %v2484_v0  ;;  %v2481_v45 = vsel %vm139_vm0, %v2475_v1, 0.0 }
0x165c   :  { %2482 = vadd.xlane.f32.xlu1 %v2481_v45 }
0x16e8   :  { %v2486_v57 = vpop.xlane.xlu0 %2485 }
0x16e9   :  { %v2488_v46 = vmul.f32 0.03125, %v2486_v57  ;;  %v2483_v47 = vpop.xlane.xlu1 %2482 }
0x16ea   :  { %v2487_v48 = vmul.f32 0.03125, %v2483_v47 }
0x16eb   :  { %v2490_v49 = vsub.f32 %v2476_v44, %v2488_v46 }
0x16ec   :  { %v2489_v51 = vsub.f32 %v2475_v1, %v2487_v48  ;;  %v2651_v1 = vsub.f32 1.0, %v2633_v39 }
0x16ed   :  { %v2492_v52 = vmul.f32 %v2490_v49, %v2490_v49 }
0x16ee   :  { %v2491_v42 = vmul.f32 %v2489_v51, %v2489_v51 }
0x16ef   :  { %v2496_v53 = vsel %vm139_vm0, %v2492_v52, 0.0 }
0x16f0   :  { %2497 = vadd.xlane.f32.xlu0 %v2496_v53  ;;  %v2493_v54 = vsel %vm139_vm0, %v2491_v42, 0.0 }
0x16f1   :  { %2494 = vadd.xlane.f32.xlu1 %v2493_v54 }
0x177d   :  { %v2498_v63 = vpop.xlane.xlu0 %2497 }
0x177e   :  { %v2500_v2 = vmul.f32 0.03125, %v2498_v63  ;;  %v2495_v3 = vpop.xlane.xlu1 %2494 }
0x177f   :  { %v2499_v4 = vmul.f32 0.03125, %v2495_v3 }
0x1780   :  { %v2502_v5 = vadd.f32 1e-12, %v2500_v2 }
0x1781   :  { %v2501_v6 = vadd.f32 1e-12, %v2499_v4 }
0x1782   :  { %3227 = vrsqrt.f32 %v2502_v5 }
0x1783   :  { %3229 = vrsqrt.f32 %v2501_v6 }
0x178c   :  { %v3228_v7 = vpop.eup %3227 }
0x178d   :  { %v3230_v9 = vpop.eup %3229  ;;  %v2506_v37 = vmul.f32 %v3228_v7, %v2490_v49 }
0x178e   :  { %v2505_v10 = vmul.f32 %v3230_v9, %v2489_v51 }
0x178f   :  { %v2514_v12 = vmul.f32 %v2771_v8, %v2506_v37 }
0x1790   :  { %v2513_v13 = vmul.f32 %v2771_v8, %v2505_v10 }
0x1791   :  { %v2522_v14 = vadd.f32 %v2772_v11, %v2514_v12 }
0x1792   :  { %v2521_v15 = vadd.f32 %v2772_v11, %v2513_v13 }
0x1793   :  { %v2524_v16 = vrot.slane %v2522_v14, 7 }
0x1795   :  { %v2527_v17 = vsel %vm2526_vm5, %v2521_v15, %v2524_v16 }
0x1796   :  { %3063 = vmatmul.mubr.msk.f32.vlgmr.msra.gmra.mrb[28].mxu1 %vm139_vm0, %v2527_v17 }
0x1869   :  { %v2608_v19 = vpop.f32.mrb[28].mxu1 }
0x186a   :  { %v2609_v20 = vadd.f32 %v2773_v18, %v2608_v19  ;;  %v3064_v21 = vpop.f32.mrb[29].mxu1 }
0x186c   :  { %3231 = vtanh.f32 %v2609_v20 }
0x1876   :  { %v3232_v23 = vpop.eup %3231 }
0x1877   :  { %v2620_v24 = vmul.f32 %v3232_v23, %v2775_v22 }
0x1879   :  { %v2622_v36 = vsel %vm2621_vm6, %v2620_v24, 0.0 }
0x187a   :  { %2623 = vadd.xlane.f32.xlu0 %v2622_v36 }
0x1907   :  { %v2624_v25 = vpop.xlane.xlu0 %2623 }
0x1908   :  { %v2632_v26 = vadd.f32 %v2776_v34, %v2624_v25 }
0x190a   :  { %v2634_v27 = vand.u32 2147483647, %v2632_v26  ;;  %v2643_v31 = vsub.f32 0.0, %v2632_v26  ;;  %v2641_v35 = vmax.f32 %v2632_v26, 0.0 }
0x190c   :  { %v2635_v28 = vsub.f32 0.0, %v2634_v27  ;;  %v2644_v38 = vmax.f32 %v2643_v31, 0.0 }
0x190e   :  { %v2636_v29 = vmul.f32 1.442695, %v2635_v28 }
0x1910   :  { %3233 = vpow2.f32 %v2636_v29 }
0x191a   :  { %v3234_v50 = vpop.eup %3233 }
0x191b   :  { %v2638_v30 = vadd.f32 1.0, %v3234_v50 }
0x191d   :  { %3235 = vlog2.f32 %v2638_v30 }
0x1927   :  { %v3236_v32 = vpop.eup %3235 }
0x1928   :  { %v2640_v33 = vmul.f32 0.6931472, %v3236_v32 }
0x192a   :  { %v2642_v40 = vadd.f32 %v2641_v35, %v2640_v33  ;;  %v2645_v41 = vadd.f32 %v2644_v38, %v2640_v33 }
0x192c   :  { %v2646_v43 = vsub.f32 0.0, %v2645_v41  ;;  %v2648_v44 = vsub.f32 0.0, %v2642_v40 }
0x192e   :  { %v2647_v0 = vmax.f32 %v2646_v43, -100.0  ;;  %v2649_v45 = vmax.f32 %v2648_v44, -100.0 }
0x1930   :  { %v2650_v57 = vmul.f32 %v2647_v0, %v2633_v39  ;;  %v2652_v46 = vmul.f32 %v2651_v1, %v2649_v45 }
0x1932   :  { %v2653_v47 = vadd.f32 %v2652_v46, %v2650_v57 }
0x1934   :  { %v2654_v48 = vsub.f32 0.0, %v2653_v47 }
0x1936   :  { %v2656_v49 = vsel %vm2655_vm7, %v2654_v48, 0.0 }
0x1937   :  { %2657 = vadd.xlane.f32.xlu1 %v2656_v49 }
0x19c4   :  { %v2658_v51 = vpop.xlane.xlu1 %2657 }
0x19c5   :  { %v2659_v52 = vrot.slane %v2658_v51, 4 }
0x19c7   :  { %v2660_v42 = vadd.f32 %v2659_v52, %v2658_v51 }
0x19c9   :  { %v2661_v53 = vrot.slane %v2660_v42, 2 }
0x19cb   :  { %v2662_v54 = vadd.f32 %v2661_v53, %v2660_v42 }
0x19cd   :  { %v2663_v55 = vrot.slane %v2662_v54, 1 }
0x19cf   :  { %v2664_v56 = vadd.f32 %v2663_v55, %v2662_v54 }
0x19d1   :  { %3151 = vpush %v2664_v56 }
0x1a02   :  { %s3152_s28 = spop %3151 }
0x1a03   :  { %s2668_s6 = smul.f32 0.5, %s3152_s28 }
0x1a05   :  { %v2669_v58 = vstv %s2668_s6 }
0x1a06   :  { %2671 = vst.msk [vmem:[#allocation12] sm:$0x1] %vm2670_vm8, %v2669_v58 }
0x1a07   :  { %3358 = shalt.err (!%p3355_p2)
}
0x1a08   :  { %s4039_s2 = sld [smem:[#allocation24_spill]] }
0x1a0e   :  { %s3359_s3 = scalar_lea.hbm %s4039_s2, 16 }
0x1a0f   :  { %p3360_p3 = scmp.ne.s32.totalorder %s4039_s2, %s3359_s3  ;;  %p3363_p4 = scmp.lt.u32.totalorder %s3359_s3, %s4039_s2 }
0x1a11   :  { %p3365_p5 = pnand %p3363_p4, %p3360_p3 }
0x1a13   :  { %3368 = shalt.err (!%p3365_p5)
}
0x1a14   :  { %2681 = dma.vmem_to_hbm [thread:$0]  %s2679_s0, 16, %s4039_s2, [#allocation5]  }
0x1a15   :  { %3375 = dma.done.wait [#allocation5], 16  }
0x1a16   :  { %3376 = vsyncadd [#allocation5], 4294967280 }
0x1a17   :  { %2685 = vsyncpa [#allocation4], 1 }
0x1a18   :  { %2686 = vsyncpa [#allocation7], 1 }
0x1a19   :  { %2687 = vsyncpa [#allocation10], 1 }
0x1a1a   :  { %2688 = vsyncpa [#allocation5], 1 }

</bundles_post_ra>
